<compile_context>
chip_gen: v6e
topology: v6e:2x2x1
jax: 0.10.0
libtpu: 0.0.40
codegen_flags: <defaults>
</compile_context>

<pallas_src>
import numpy as np
import jax
import jax.numpy as jnp
from jax.experimental import pallas as pl
from jax.experimental.pallas import tpu as pltpu

# ----- model hyperparameters (module-level globals in the original file) -----
d_model = 32
d_k = 8
d_v = 8
n_heads = 4
d_ff = 64
n_layers = 2

HK = n_heads * d_k          # 32
HV = n_heads * d_v          # 32
QKV = 2 * HK + HV           # 96  (packed [Wq | Wk | Wv] lane width)

LN_EPS = 1e-5               # PyTorch nn.LayerNorm default
NEG_INF = -1e9
LANE = 128

# rows of the packed per-layer (8, 128) parameter slab (each param starts at lane 0)
_R_BQKV, _R_BO, _R_C1, _R_C2, _R_G1, _R_BE1, _R_G2, _R_BE2 = range(8)
# rows of the packed head (8, 128) parameter slab
_R_BPOOL, _R_BCLS, _R_BLIN, _R_LNG, _R_LNB, _R_BDEC = range(6)


# ------------------------------------------------------------------
# positional encoding (setup-time glue, identical math to the PyTorch fn)
# ------------------------------------------------------------------
def positional_encoding(n_position, dm):
    pos = np.arange(n_position)[:, None].astype(np.float64)
    hid = np.arange(dm)[None, :].astype(np.float64)
    table = pos / np.power(10000.0, hid / dm)
    table[:, 0::2] = np.sin(table[:, 0::2])
    table[:, 1::2] = np.cos(table[:, 1::2])
    return jnp.asarray(table, dtype=jnp.float32)


def gelu(x):
    # Hugging Face erf-based gelu (reference / XLA side)
    return x * 0.5 * (1.0 + jax.lax.erf(x / np.sqrt(2.0)))


def _erf_poly(z):
    # TODO(synk): math.erf has no guaranteed Mosaic lowering; use Abramowitz&Stegun 7.1.26
    # (|error| <= 1.5e-7, numerically equivalent at f32 / test tolerance).
    a1, a2, a3, a4, a5 = 0.254829592, -0.284496736, 1.421413741, -1.453152027, 1.061405429
    p = 0.3275911
    az = jnp.abs(z)
    t = 1.0 / (1.0 + p * az)
    poly = t * (a1 + t * (a2 + t * (a3 + t * (a4 + t * a5))))
    e = 1.0 - poly * jnp.exp(-az * az)
    return jnp.where(z < 0, -e, e)


def _gelu_kernel(x):
    return x * 0.5 * (1.0 + _erf_poly(x * np.float32(1.0 / np.sqrt(2.0))))


def _layer_norm(v, g, b):
    mu = jnp.mean(v, axis=-1, keepdims=True)
    var = jnp.mean((v - mu) ** 2, axis=-1, keepdims=True)
    return (v - mu) * jax.lax.rsqrt(var + LN_EPS) * g + b


# ------------------------------------------------------------------
# Fully fused forward: embedding + encoder stack + Transformer_Mix head in one pallas_call
# ------------------------------------------------------------------
def transformer_mix_forward(enc_inputs, pad_mask, params):
    B, S = enc_inputs.shape
    V, E = params["emb"].shape
    num_class = params["b_cls"].shape[0]
    num_label = params["b_dec"].shape[0]
    BS = B * S
    BHS = n_heads * BS
    # TODO(synk): block-diagonal group id uses a bitwise trick (i & ~(S-1)); requires pow2 S.
    assert S & (S - 1) == 0

    ids_col = enc_inputs.reshape(BS, 1).astype(jnp.int32)
    pad_col = pad_mask.reshape(BS, 1).astype(jnp.int32)
    pad_row = pad_mask.reshape(1, BS).astype(jnp.int32)

    scale = np.float32(1.0 / np.sqrt(d_k))

    def kernel(ids_ref, padc_ref, padr_ref, emb_ref, pos_ref, wfc_ref, bfc_ref,
               wqkv_ref, wo_ref, w1_ref, w2_ref, vec_ref, hw_ref, hv_ref,
               tgt_ref, cls_ref):
        # ---- embedding lookup as a one-hot matmul (vocab table is tiny) ----
        ids = ids_ref[...]                                             # (BS, 1) int32
        vios = jax.lax.broadcasted_iota(jnp.int32, (BS, V), 1)
        onehot = (ids == vios).astype(jnp.float32)                     # (BS, V)
        emb = jnp.dot(onehot, emb_ref[...], preferred_element_type=jnp.float32)   # (BS, E)

        # ---- input projection + positional encoding (batch stacked on sublanes) ----
        pos = jnp.concatenate([pos_ref[...]] * B, axis=0)              # (BS, D)
        x = (jnp.dot(emb, wfc_ref[...], preferred_element_type=jnp.float32)
             + bfc_ref[...] + pos)                                     # (BS, D)

        # ---- additive attention mask: block-diagonal over (head, batch) + key padding ----
        padk = jnp.concatenate([padr_ref[...]] * n_heads, axis=1)      # (1, BHS)
        himask = jnp.int32(~(S - 1))
        gi = jax.lax.broadcasted_iota(jnp.int32, (BHS, BHS), 0) & himask
        gj = jax.lax.broadcasted_iota(jnp.int32, (BHS, BHS), 1) & himask
        valid = (gi == gj) & (padk == 0)
        amask = jnp.where(valid, 0.0, NEG_INF).astype(jnp.float32)     # (BHS, BHS)

        for li in range(n_layers):                                     # static unroll
            vec = vec_ref[li]                                          # (8, 128), lane-0 aligned
            bqkv = vec[_R_BQKV:_R_BQKV + 1, :QKV]
            bo   = vec[_R_BO:_R_BO + 1, :d_model]
            c1   = vec[_R_C1:_R_C1 + 1, :d_ff]
            c2   = vec[_R_C2:_R_C2 + 1, :d_model]
            g1   = vec[_R_G1:_R_G1 + 1, :d_model]
            be1  = vec[_R_BE1:_R_BE1 + 1, :d_model]
            g2   = vec[_R_G2:_R_G2 + 1, :d_model]
            be2  = vec[_R_BE2:_R_BE2 + 1, :d_model]

            # fused QKV projection: one MXU matmul
            qkv = jnp.dot(x, wqkv_ref[li], preferred_element_type=jnp.float32) + bqkv   # (BS, 96)

            # head-major stacking on sublanes: rows ordered (head, batch, seq)
            q_hm = jnp.concatenate(
                [qkv[:, h * d_k:(h + 1) * d_k] for h in range(n_heads)], axis=0)        # (BHS, dk)
            k_hm = jnp.concatenate(
                [qkv[:, HK + h * d_k:HK + (h + 1) * d_k] for h in range(n_heads)], axis=0)
            v_hm = jnp.concatenate(
                [qkv[:, 2 * HK + h * d_v:2 * HK + (h + 1) * d_v] for h in range(n_heads)], axis=0)

            # one scores matmul + one context matmul for all heads x batches
            scores = jax.lax.dot_general(
                q_hm, k_hm, (((1,), (1,)), ((), ())),
                preferred_element_type=jnp.float32) * scale + amask                     # (BHS, BHS)
            m = jnp.max(scores, axis=-1, keepdims=True)
            e = jnp.exp(scores - m)
            attn = e / jnp.sum(e, axis=-1, keepdims=True)              # exact softmax
            ctx_hm = jnp.dot(attn, v_hm, preferred_element_type=jnp.float32)            # (BHS, dv)

            # back to (BS, H*dv)
            context = jnp.concatenate(
                [ctx_hm[h * BS:(h + 1) * BS, :] for h in range(n_heads)], axis=1)       # (BS, HV)

            mha = jnp.dot(context, wo_ref[li], preferred_element_type=jnp.float32) + bo
            y = _layer_norm(mha + x, g1, be1)

            # PoswiseFFN: conv1d(k=1) == matmul in (tokens, features) layout
            h1 = jnp.maximum(
                jnp.dot(y, w1_ref[li], preferred_element_type=jnp.float32) + c1, 0.0)
            h2 = jnp.dot(h1, w2_ref[li], preferred_element_type=jnp.float32) + c2
            x = _layer_norm(h2 + y, g2, be2)

        # ---- Transformer_Mix head (fused epilogue) ----
        hv = hv_ref[...]                                               # (8, 128)
        cls_rows = jnp.concatenate([x[b * S:b * S + 1, :] for b in range(B)], axis=0)   # (B, D)
        h_pooled = jnp.tanh(
            jnp.dot(cls_rows, hw_ref[0], preferred_element_type=jnp.float32)
            + hv[_R_BPOOL:_R_BPOOL + 1, :d_model])
        cls_ref[...] = (jnp.dot(h_pooled, hw_ref[1],
                                preferred_element_type=jnp.float32)[:, :num_class]
                        + hv[_R_BCLS:_R_BCLS + 1, :num_class])

        notpad = (padc_ref[...] == 0).astype(jnp.float32)              # (BS, 1)
        hm = x * notpad
        hm = (jnp.dot(hm, hw_ref[2], preferred_element_type=jnp.float32)
              + hv[_R_BLIN:_R_BLIN + 1, :d_model])
        hm = _gelu_kernel(hm)
        hm = _layer_norm(hm, hv[_R_LNG:_R_LNG + 1, :d_model], hv[_R_LNB:_R_LNB + 1, :d_model])
        tgt_ref[...] = ((jnp.dot(hm, hw_ref[3],
                                 preferred_element_type=jnp.float32)[:, :num_label]
                         + hv[_R_BDEC:_R_BDEC + 1, :num_label]) * notpad)

    def rep2(shape):
        return pl.BlockSpec(shape, lambda i: (0, 0))

    def rep3(shape):
        return pl.BlockSpec(shape, lambda i: (0, 0, 0))

    tgt_all, logits_clsf = pl.pallas_call(
        kernel,
        out_shape=(jax.ShapeDtypeStruct((BS, num_label), jnp.float32),
                   jax.ShapeDtypeStruct((B, num_class), jnp.float32)),
        grid=(1,),
        in_specs=[
            rep2((BS, 1)),                     # token ids
            rep2((BS, 1)),                     # pad mask (column orientation)
            rep2((1, BS)),                     # pad mask (row orientation)
            rep2((V, E)),                      # embedding table
            rep2((S, d_model)),                # positional encoding
            rep2((E, d_model)),                # w_fc
            rep2((1, d_model)),                # b_fc
            rep3((n_layers, d_model, QKV)),    # packed [Wq|Wk|Wv]
            rep3((n_layers, HV, d_model)),     # Wo
            rep3((n_layers, d_model, d_ff)),   # W1
            rep3((n_layers, d_ff, d_model)),   # W2
            rep3((n_layers, 8, LANE)),         # packed per-layer biases / LN params
            rep3((4, d_model, d_model)),       # packed head weight matrices
            rep2((8, LANE)),                   # packed head biases / LN params
        ],
        out_specs=(rep2((BS, num_label)), rep2((B, num_class))),
        compiler_params=pltpu.CompilerParams(dimension_semantics=("arbitrary",)),
    )(ids_col, pad_col, pad_row, params["emb"], params["pos"], params["w_fc"],
      params["b_fc"], params["wqkv"], params["wo_s"], params["w1_s"], params["w2_s"],
      params["vecs"], params["head_w"], params["head_vec"])

    logits_tgt = tgt_all.reshape(B, S, num_label)[:, 1:, :]
    return logits_tgt, logits_clsf


# ------------------------------------------------------------------
# Pure-JAX reference (correctness check only, mirrors the PyTorch module)
# ------------------------------------------------------------------
def _ln_ref(v, g, b):
    mu = v.mean(-1, keepdims=True)
    var = ((v - mu) ** 2).mean(-1, keepdims=True)
    return (v - mu) * jax.lax.rsqrt(var + LN_EPS) * g + b


def _mix_head_ref(enc_out, pad_mask, params):
    h_pooled = jnp.tanh(enc_out[:, 0, :] @ params["w_pool"] + params["b_pool"])
    logits_clsf = h_pooled @ params["w_cls"] + params["b_cls"]
    mask_tgt = (~pad_mask).astype(jnp.float32)[:, :, None]
    h_masked = enc_out * mask_tgt
    h_masked = gelu(h_masked @ params["w_lin"] + params["b_lin"])
    h_masked = _ln_ref(h_masked, params["ln_g"], params["ln_b"])
    logits_tgt = (h_masked @ params["w_dec"] + params["b_dec"]) * mask_tgt
    return logits_tgt[:, 1:, :], logits_clsf


def transformer_mix_ref(enc_inputs, pad_mask, params):
    emb = jnp.take(params["emb"], enc_inputs, axis=0)
    x = emb @ params["w_fc"] + params["b_fc"][0] + params["pos"][None]
    B, S, _ = x.shape
    for p in params["layers"]:
        q = (x @ p["wq"] + p["bq"]).reshape(B, S, n_heads, d_k).transpose(0, 2, 1, 3)
        k = (x @ p["wk"] + p["bk"]).reshape(B, S, n_heads, d_k).transpose(0, 2, 1, 3)
        v = (x @ p["wv"] + p["bv"]).reshape(B, S, n_heads, d_v).transpose(0, 2, 1, 3)
        scores = jnp.einsum("bhqd,bhkd->bhqk", q, k) / np.sqrt(d_k)
        scores = jnp.where(pad_mask[:, None, None, :], NEG_INF, scores)
        attn = jax.nn.softmax(scores, axis=-1)
        ctx = jnp.einsum("bhqk,bhkd->bhqd", attn, v).transpose(0, 2, 1, 3).reshape(B, S, HV)
        y = _ln_ref(ctx @ p["wo"] + p["bo"] + x, p["ln1_g"], p["ln1_b"])
        h1 = jnp.maximum(y @ p["w1"] + p["c1"], 0.0)
        x = _ln_ref(h1 @ p["w2"] + p["c2"] + y, p["ln2_g"], p["ln2_b"])
    return _mix_head_ref(x, pad_mask, params)


# ------------------------------------------------------------------
# Deterministic parameter construction (+ packed views for the fused kernel)
# ------------------------------------------------------------------
def _pad_lane(v, n=LANE):
    return jnp.pad(v, (0, n - v.shape[0]))


def _pad_cols(w, n=d_model):
    return jnp.pad(w, ((0, 0), (0, n - w.shape[1])))


def make_params(key, vocab_size, emb_dim, seq_len, num_class, num_label):
    keys = jax.random.split(key, 64)
    ki = iter(keys)

    def rnd(shape, s=0.05):
        return (s * jax.random.normal(next(ki), shape)).astype(jnp.float32)

    layers = []
    for _ in range(n_layers):
        layers.append({
            "wq": rnd((d_model, HK)), "bq": rnd((HK,), 0.01),
            "wk": rnd((d_model, HK)), "bk": rnd((HK,), 0.01),
            "wv": rnd((d_model, HV)), "bv": rnd((HV,), 0.01),
            "wo": rnd((HV, d_model)), "bo": rnd((d_model,), 0.01),
            # conv1/conv2 (kernel_size=1) stored as (in, out) matmul matrices
            "w1": rnd((d_model, d_ff)), "c1": rnd((d_ff,), 0.01),
            "w2": rnd((d_ff, d_model)), "c2": rnd((d_model,), 0.01),
            "ln1_g": jnp.ones((d_model,), jnp.float32),
            "ln1_b": jnp.zeros((d_model,), jnp.float32),
            "ln2_g": jnp.ones((d_model,), jnp.float32),
            "ln2_b": jnp.zeros((d_model,), jnp.float32),
        })

    params = {
        "emb": rnd((vocab_size, emb_dim), 0.1),      # pretrained w2v table (src_emb)
        "w_fc": rnd((emb_dim, d_model)),
        "b_fc": rnd((1, d_model), 0.01),
        "pos": positional_encoding(seq_len, d_model),
        "layers": layers,
        # Transformer_Mix head
        "w_pool": rnd((d_model, d_model)), "b_pool": rnd((d_model,), 0.01),
        "w_cls": rnd((d_model, num_class)), "b_cls": rnd((num_class,), 0.01),
        "w_lin": rnd((d_model, d_model)), "b_lin": rnd((d_model,), 0.01),
        "ln_g": jnp.ones((d_model,), jnp.float32),
        "ln_b": jnp.zeros((d_model,), jnp.float32),
        "w_dec": rnd((d_model, num_label)), "b_dec": rnd((num_label,), 0.01),
    }

    # packed, layer-stacked views consumed by the fused Pallas kernel
    params["wqkv"] = jnp.stack(
        [jnp.concatenate([p["wq"], p["wk"], p["wv"]], axis=1) for p in layers])
    params["wo_s"] = jnp.stack([p["wo"] for p in layers])
    params["w1_s"] = jnp.stack([p["w1"] for p in layers])
    params["w2_s"] = jnp.stack([p["w2"] for p in layers])
    params["vecs"] = jnp.stack([jnp.stack([
        _pad_lane(jnp.concatenate([p["bq"], p["bk"], p["bv"]])),
        _pad_lane(p["bo"]), _pad_lane(p["c1"]), _pad_lane(p["c2"]),
        _pad_lane(p["ln1_g"]), _pad_lane(p["ln1_b"]),
        _pad_lane(p["ln2_g"]), _pad_lane(p["ln2_b"])]) for p in layers])
    params["head_w"] = jnp.stack([params["w_pool"], _pad_cols(params["w_cls"]),
                                  params["w_lin"], _pad_cols(params["w_dec"])])
    params["head_vec"] = jnp.stack([
        _pad_lane(params["b_pool"]), _pad_lane(params["b_cls"]),
        _pad_lane(params["b_lin"]), _pad_lane(params["ln_g"]),
        _pad_lane(params["ln_b"]), _pad_lane(params["b_dec"]),
        jnp.zeros((LANE,), jnp.float32), jnp.zeros((LANE,), jnp.float32)])

    assert params["vecs"].shape == (n_layers, 8, LANE)
    assert params["head_vec"].shape == (8, LANE)
    return params


if __name__ == "__main__":
    B = 2
    src_len = 7
    S = src_len + 1          # forward adds pos_emb over range(src_len + 1)
    vocab = 50
    emb_dim = 16             # pre_w2v embedding width (fc input)
    num_class = 4            # config['num_class']
    num_label = 12           # config['num_label']

    key = jax.random.PRNGKey(0)
    k_tok, k_par = jax.random.split(key)

    enc_inputs = jax.random.randint(k_tok, (B, S), 1, vocab, dtype=jnp.int32)
    enc_inputs = enc_inputs.at[1, -2:].set(0)          # pad tokens in batch 1
    pad_mask = enc_inputs == 0                         # (B, S) key-pad mask

    params = make_params(k_par, vocab, emb_dim, S, num_class, num_label)

    fwd = jax.jit(transformer_mix_forward)
    logits_tgt, logits_clsf = fwd(enc_inputs, pad_mask, params)
    logits_tgt = jax.block_until_ready(logits_tgt)
    logits_clsf = jax.block_until_ready(logits_clsf)

    # correctness check against the pure-JAX reference
    ref_tgt, ref_clsf = transformer_mix_ref(enc_inputs, pad_mask, params)
    assert logits_tgt.shape == (B, S - 1, num_label)
    assert logits_clsf.shape == (B, num_class)
    np.testing.assert_allclose(np.asarray(logits_tgt), np.asarray(ref_tgt),
                               rtol=2e-3, atol=2e-3)
    np.testing.assert_allclose(np.asarray(logits_clsf), np.asarray(ref_clsf),
                               rtol=2e-3, atol=2e-3)

    print("KERNEL_OK")
</pallas_src>

<mosaic_0001>
module attributes {stable_mosaic.version = 11 : i64} {
  func.func @kernel(%arg0: i32, %arg1: memref<16x1xi32, #tpu.memory_space<vmem>>, %arg2: memref<16x1xi32, #tpu.memory_space<vmem>>, %arg3: memref<1x16xi32, #tpu.memory_space<vmem>>, %arg4: memref<50x16xf32, #tpu.memory_space<vmem>>, %arg5: memref<8x32xf32, #tpu.memory_space<vmem>>, %arg6: memref<16x32xf32, #tpu.memory_space<vmem>>, %arg7: memref<1x32xf32, #tpu.memory_space<vmem>>, %arg8: memref<2x32x96xf32, #tpu.memory_space<vmem>>, %arg9: memref<2x32x32xf32, #tpu.memory_space<vmem>>, %arg10: memref<2x32x64xf32, #tpu.memory_space<vmem>>, %arg11: memref<2x64x32xf32, #tpu.memory_space<vmem>>, %arg12: memref<2x8x128xf32, #tpu.memory_space<vmem>>, %arg13: memref<4x32x32xf32, #tpu.memory_space<vmem>>, %arg14: memref<8x128xf32, #tpu.memory_space<vmem>>, %arg15: memref<16x12xf32, #tpu.memory_space<vmem>>, %arg16: memref<2x4xf32, #tpu.memory_space<vmem>>) attributes {dimension_semantics = [#tpu.dimension_semantics<arbitrary>], iteration_bounds = array<i64: 1>, scalar_prefetch = 0 : i64, scratch_operands = 0 : i64, tpu.core_type = #tpu.core_type<tc>, window_params = [{pipeline_mode = #tpu.pipeline_mode<synchronous>, transform_indices = @transform_0, window_bounds = array<i64: 16, 1>}, {pipeline_mode = #tpu.pipeline_mode<synchronous>, transform_indices = @transform_1, window_bounds = array<i64: 16, 1>}, {pipeline_mode = #tpu.pipeline_mode<synchronous>, transform_indices = @transform_2, window_bounds = array<i64: 1, 16>}, {pipeline_mode = #tpu.pipeline_mode<synchronous>, transform_indices = @transform_3, window_bounds = array<i64: 50, 16>}, {pipeline_mode = #tpu.pipeline_mode<synchronous>, transform_indices = @transform_4, window_bounds = array<i64: 8, 32>}, {pipeline_mode = #tpu.pipeline_mode<synchronous>, transform_indices = @transform_5, window_bounds = array<i64: 16, 32>}, {pipeline_mode = #tpu.pipeline_mode<synchronous>, transform_indices = @transform_6, window_bounds = array<i64: 1, 32>}, {pipeline_mode = #tpu.pipeline_mode<synchronous>, transform_indices = @transform_7, window_bounds = array<i64: 2, 32, 96>}, {pipeline_mode = #tpu.pipeline_mode<synchronous>, transform_indices = @transform_8, window_bounds = array<i64: 2, 32, 32>}, {pipeline_mode = #tpu.pipeline_mode<synchronous>, transform_indices = @transform_9, window_bounds = array<i64: 2, 32, 64>}, {pipeline_mode = #tpu.pipeline_mode<synchronous>, transform_indices = @transform_10, window_bounds = array<i64: 2, 64, 32>}, {pipeline_mode = #tpu.pipeline_mode<synchronous>, transform_indices = @transform_11, window_bounds = array<i64: 2, 8, 128>}, {pipeline_mode = #tpu.pipeline_mode<synchronous>, transform_indices = @transform_12, window_bounds = array<i64: 4, 32, 32>}, {pipeline_mode = #tpu.pipeline_mode<synchronous>, transform_indices = @transform_13, window_bounds = array<i64: 8, 128>}, {pipeline_mode = #tpu.pipeline_mode<synchronous>, transform_indices = @transform_14, window_bounds = array<i64: 16, 12>}, {pipeline_mode = #tpu.pipeline_mode<synchronous>, transform_indices = @transform_15, window_bounds = array<i64: 2, 4>}]} {
    %c0 = arith.constant 0 : index
    %c0_0 = arith.constant 0 : index
    %0 = vector.load %arg1[%c0, %c0_0] : memref<16x1xi32, #tpu.memory_space<vmem>>, vector<16x1xi32>
    %1 = tpu.iota {dimensions = array<i32: 1>} : vector<16x50xi32>
    %2 = vector.broadcast %0 : vector<16x1xi32> to vector<16x50xi32>
    %3 = arith.cmpi eq, %2, %1 : vector<16x50xi32>
    %4 = arith.extui %3 : vector<16x50xi1> to vector<16x50xi32>
    %5 = arith.sitofp %4 : vector<16x50xi32> to vector<16x50xf32>
    %c0_1 = arith.constant 0 : index
    %c0_2 = arith.constant 0 : index
    %6 = vector.load %arg4[%c0_1, %c0_2] : memref<50x16xf32, #tpu.memory_space<vmem>>, vector<50x16xf32>
    %cst = arith.constant dense<0.000000e+00> : vector<16x16xf32>
    %7 = tpu.matmul %5, %6, %cst {dimension_numbers = #tpu.dot_dimension_numbers<[1], [0], [0], [1], [0, 0, 1, 1], [], []>} : vector<16x50xf32>, vector<50x16xf32>, vector<16x16xf32> -> vector<16x16xf32>
    %c0_3 = arith.constant 0 : index
    %c0_4 = arith.constant 0 : index
    %8 = vector.load %arg5[%c0_3, %c0_4] : memref<8x32xf32, #tpu.memory_space<vmem>>, vector<8x32xf32>
    %9 = tpu.concatenate %8, %8 in 0 : vector<8x32xf32>, vector<8x32xf32> -> vector<16x32xf32>
    %c0_5 = arith.constant 0 : index
    %c0_6 = arith.constant 0 : index
    %10 = vector.load %arg6[%c0_5, %c0_6] : memref<16x32xf32, #tpu.memory_space<vmem>>, vector<16x32xf32>
    %cst_7 = arith.constant dense<0.000000e+00> : vector<16x32xf32>
    %11 = tpu.matmul %7, %10, %cst_7 {dimension_numbers = #tpu.dot_dimension_numbers<[1], [0], [0], [1], [0, 0, 1, 1], [], []>} : vector<16x16xf32>, vector<16x32xf32>, vector<16x32xf32> -> vector<16x32xf32>
    %c0_8 = arith.constant 0 : index
    %c0_9 = arith.constant 0 : index
    %12 = vector.load %arg7[%c0_8, %c0_9] : memref<1x32xf32, #tpu.memory_space<vmem>>, vector<1x32xf32>
    %13 = vector.broadcast %12 : vector<1x32xf32> to vector<16x32xf32>
    %14 = arith.addf %11, %13 : vector<16x32xf32>
    %15 = arith.addf %14, %9 : vector<16x32xf32>
    %c0_10 = arith.constant 0 : index
    %c0_11 = arith.constant 0 : index
    %16 = vector.load %arg3[%c0_10, %c0_11] : memref<1x16xi32, #tpu.memory_space<vmem>>, vector<1x16xi32>
    %17 = tpu.concatenate %16, %16, %16, %16 in 1 : vector<1x16xi32>, vector<1x16xi32>, vector<1x16xi32>, vector<1x16xi32> -> vector<1x64xi32>
    %18 = tpu.iota {dimensions = array<i32: 0>} : vector<64x64xi32>
    %c-8_i32 = arith.constant -8 : i32
    %19 = vector.broadcast %c-8_i32 : i32 to vector<64x64xi32>
    %20 = arith.andi %18, %19 : vector<64x64xi32>
    %21 = tpu.iota {dimensions = array<i32: 1>} : vector<64x64xi32>
    %c-8_i32_12 = arith.constant -8 : i32
    %22 = vector.broadcast %c-8_i32_12 : i32 to vector<64x64xi32>
    %23 = arith.andi %21, %22 : vector<64x64xi32>
    %24 = arith.cmpi eq, %20, %23 : vector<64x64xi32>
    %c0_i32 = arith.constant 0 : i32
    %25 = vector.broadcast %c0_i32 : i32 to vector<1x64xi32>
    %26 = arith.cmpi eq, %17, %25 : vector<1x64xi32>
    %27 = vector.broadcast %26 : vector<1x64xi1> to vector<64x64xi1>
    %28 = arith.andi %24, %27 : vector<64x64xi1>
    %cst_13 = arith.constant 0.000000e+00 : f32
    %cst_14 = arith.constant -1.000000e+09 : f32
    %29 = vector.broadcast %cst_13 : f32 to vector<64x64xf32>
    %30 = vector.broadcast %cst_14 : f32 to vector<64x64xf32>
    %31 = arith.select %28, %29, %30 : vector<64x64xi1>, vector<64x64xf32>
    %c0_15 = arith.constant 0 : index
    %c0_16 = arith.constant 0 : index
    %c0_17 = arith.constant 0 : index
    %32 = vector.load %arg12[%c0_15, %c0_16, %c0_17] : memref<2x8x128xf32, #tpu.memory_space<vmem>>, vector<1x8x128xf32>
    %33 = vector.shape_cast %32 : vector<1x8x128xf32> to vector<8x128xf32>
    %34 = vector.extract_strided_slice %33 {offsets = [0, 0], sizes = [1, 96], strides = [1, 1]} : vector<8x128xf32> to vector<1x96xf32>
    %35 = vector.extract_strided_slice %33 {offsets = [1, 0], sizes = [1, 32], strides = [1, 1]} : vector<8x128xf32> to vector<1x32xf32>
    %36 = vector.extract_strided_slice %33 {offsets = [2, 0], sizes = [1, 64], strides = [1, 1]} : vector<8x128xf32> to vector<1x64xf32>
    %37 = vector.extract_strided_slice %33 {offsets = [3, 0], sizes = [1, 32], strides = [1, 1]} : vector<8x128xf32> to vector<1x32xf32>
    %38 = vector.extract_strided_slice %33 {offsets = [4, 0], sizes = [1, 32], strides = [1, 1]} : vector<8x128xf32> to vector<1x32xf32>
    %39 = vector.extract_strided_slice %33 {offsets = [5, 0], sizes = [1, 32], strides = [1, 1]} : vector<8x128xf32> to vector<1x32xf32>
    %40 = vector.extract_strided_slice %33 {offsets = [6, 0], sizes = [1, 32], strides = [1, 1]} : vector<8x128xf32> to vector<1x32xf32>
    %41 = vector.extract_strided_slice %33 {offsets = [7, 0], sizes = [1, 32], strides = [1, 1]} : vector<8x128xf32> to vector<1x32xf32>
    %c0_18 = arith.constant 0 : index
    %c0_19 = arith.constant 0 : index
    %c0_20 = arith.constant 0 : index
    %42 = vector.load %arg8[%c0_18, %c0_19, %c0_20] : memref<2x32x96xf32, #tpu.memory_space<vmem>>, vector<1x32x96xf32>
    %43 = vector.shape_cast %42 : vector<1x32x96xf32> to vector<32x96xf32>
    %cst_21 = arith.constant dense<0.000000e+00> : vector<16x96xf32>
    %44 = tpu.matmul %15, %43, %cst_21 {dimension_numbers = #tpu.dot_dimension_numbers<[1], [0], [0], [1], [0, 0, 1, 1], [], []>} : vector<16x32xf32>, vector<32x96xf32>, vector<16x96xf32> -> vector<16x96xf32>
    %45 = vector.broadcast %34 : vector<1x96xf32> to vector<16x96xf32>
    %46 = arith.addf %44, %45 : vector<16x96xf32>
    %47 = vector.extract_strided_slice %46 {offsets = [0, 0], sizes = [16, 8], strides = [1, 1]} : vector<16x96xf32> to vector<16x8xf32>
    %48 = vector.extract_strided_slice %46 {offsets = [0, 8], sizes = [16, 8], strides = [1, 1]} : vector<16x96xf32> to vector<16x8xf32>
    %49 = vector.extract_strided_slice %46 {offsets = [0, 16], sizes = [16, 8], strides = [1, 1]} : vector<16x96xf32> to vector<16x8xf32>
    %50 = vector.extract_strided_slice %46 {offsets = [0, 24], sizes = [16, 8], strides = [1, 1]} : vector<16x96xf32> to vector<16x8xf32>
    %51 = tpu.concatenate %47, %48, %49, %50 in 0 : vector<16x8xf32>, vector<16x8xf32>, vector<16x8xf32>, vector<16x8xf32> -> vector<64x8xf32>
    %52 = vector.extract_strided_slice %46 {offsets = [0, 32], sizes = [16, 8], strides = [1, 1]} : vector<16x96xf32> to vector<16x8xf32>
    %53 = vector.extract_strided_slice %46 {offsets = [0, 40], sizes = [16, 8], strides = [1, 1]} : vector<16x96xf32> to vector<16x8xf32>
    %54 = vector.extract_strided_slice %46 {offsets = [0, 48], sizes = [16, 8], strides = [1, 1]} : vector<16x96xf32> to vector<16x8xf32>
    %55 = vector.extract_strided_slice %46 {offsets = [0, 56], sizes = [16, 8], strides = [1, 1]} : vector<16x96xf32> to vector<16x8xf32>
    %56 = tpu.concatenate %52, %53, %54, %55 in 0 : vector<16x8xf32>, vector<16x8xf32>, vector<16x8xf32>, vector<16x8xf32> -> vector<64x8xf32>
    %57 = vector.extract_strided_slice %46 {offsets = [0, 64], sizes = [16, 8], strides = [1, 1]} : vector<16x96xf32> to vector<16x8xf32>
    %58 = vector.extract_strided_slice %46 {offsets = [0, 72], sizes = [16, 8], strides = [1, 1]} : vector<16x96xf32> to vector<16x8xf32>
    %59 = vector.extract_strided_slice %46 {offsets = [0, 80], sizes = [16, 8], strides = [1, 1]} : vector<16x96xf32> to vector<16x8xf32>
    %60 = vector.extract_strided_slice %46 {offsets = [0, 88], sizes = [16, 8], strides = [1, 1]} : vector<16x96xf32> to vector<16x8xf32>
    %61 = tpu.concatenate %57, %58, %59, %60 in 0 : vector<16x8xf32>, vector<16x8xf32>, vector<16x8xf32>, vector<16x8xf32> -> vector<64x8xf32>
    %cst_22 = arith.constant dense<0.000000e+00> : vector<64x64xf32>
    %62 = tpu.matmul %51, %56, %cst_22 {dimension_numbers = #tpu.dot_dimension_numbers<[1], [1], [0], [0], [0, 0, 1, 0], [], []>} : vector<64x8xf32>, vector<64x8xf32>, vector<64x64xf32> -> vector<64x64xf32>
    %cst_23 = arith.constant 0.353553385 : f32
    %63 = vector.broadcast %cst_23 : f32 to vector<64x64xf32>
    %64 = arith.mulf %62, %63 : vector<64x64xf32>
    %65 = arith.addf %64, %31 : vector<64x64xf32>
    %cst_24 = arith.constant dense<0xFF800000> : vector<64xf32>
    %66 = vector.multi_reduction <maximumf>, %65, %cst_24 [1] : vector<64x64xf32> to vector<64xf32>
    %67 = vector.shape_cast %66 : vector<64xf32> to vector<64x1xf32>
    %68 = vector.broadcast %67 : vector<64x1xf32> to vector<64x64xf32>
    %69 = arith.subf %65, %68 : vector<64x64xf32>
    %70 = math.exp %69 : vector<64x64xf32>
    %cst_25 = arith.constant dense<0.000000e+00> : vector<64xf32>
    %71 = vector.multi_reduction <add>, %70, %cst_25 [1] : vector<64x64xf32> to vector<64xf32>
    %72 = vector.shape_cast %71 : vector<64xf32> to vector<64x1xf32>
    %73 = vector.broadcast %72 : vector<64x1xf32> to vector<64x64xf32>
    %74 = arith.divf %70, %73 : vector<64x64xf32>
    %cst_26 = arith.constant dense<0.000000e+00> : vector<64x8xf32>
    %75 = tpu.matmul %74, %61, %cst_26 {dimension_numbers = #tpu.dot_dimension_numbers<[1], [0], [0], [1], [0, 0, 1, 1], [], []>} : vector<64x64xf32>, vector<64x8xf32>, vector<64x8xf32> -> vector<64x8xf32>
    %76 = vector.extract_strided_slice %75 {offsets = [0, 0], sizes = [16, 8], strides = [1, 1]} : vector<64x8xf32> to vector<16x8xf32>
    %77 = vector.extract_strided_slice %75 {offsets = [16, 0], sizes = [16, 8], strides = [1, 1]} : vector<64x8xf32> to vector<16x8xf32>
    %78 = vector.extract_strided_slice %75 {offsets = [32, 0], sizes = [16, 8], strides = [1, 1]} : vector<64x8xf32> to vector<16x8xf32>
    %79 = vector.extract_strided_slice %75 {offsets = [48, 0], sizes = [16, 8], strides = [1, 1]} : vector<64x8xf32> to vector<16x8xf32>
    %80 = tpu.concatenate %76, %77, %78, %79 in 1 : vector<16x8xf32>, vector<16x8xf32>, vector<16x8xf32>, vector<16x8xf32> -> vector<16x32xf32>
    %c0_27 = arith.constant 0 : index
    %c0_28 = arith.constant 0 : index
    %c0_29 = arith.constant 0 : index
    %81 = vector.load %arg9[%c0_27, %c0_28, %c0_29] : memref<2x32x32xf32, #tpu.memory_space<vmem>>, vector<1x32x32xf32>
    %82 = vector.shape_cast %81 : vector<1x32x32xf32> to vector<32x32xf32>
    %cst_30 = arith.constant dense<0.000000e+00> : vector<16x32xf32>
    %83 = tpu.matmul %80, %82, %cst_30 {dimension_numbers = #tpu.dot_dimension_numbers<[1], [0], [0], [1], [0, 0, 1, 1], [], []>} : vector<16x32xf32>, vector<32x32xf32>, vector<16x32xf32> -> vector<16x32xf32>
    %84 = vector.broadcast %35 : vector<1x32xf32> to vector<16x32xf32>
    %85 = arith.addf %83, %84 : vector<16x32xf32>
    %86 = arith.addf %85, %15 : vector<16x32xf32>
    %cst_31 = arith.constant dense<0.000000e+00> : vector<16xf32>
    %87 = vector.multi_reduction <add>, %86, %cst_31 [1] : vector<16x32xf32> to vector<16xf32>
    %88 = vector.shape_cast %87 : vector<16xf32> to vector<16x1xf32>
    %cst_32 = arith.constant 3.200000e+01 : f32
    %89 = vector.broadcast %cst_32 : f32 to vector<16x1xf32>
    %90 = arith.divf %88, %89 : vector<16x1xf32>
    %91 = vector.broadcast %90 : vector<16x1xf32> to vector<16x32xf32>
    %92 = arith.subf %86, %91 : vector<16x32xf32>
    %93 = arith.mulf %92, %92 : vector<16x32xf32>
    %cst_33 = arith.constant dense<0.000000e+00> : vector<16xf32>
    %94 = vector.multi_reduction <add>, %93, %cst_33 [1] : vector<16x32xf32> to vector<16xf32>
    %95 = vector.shape_cast %94 : vector<16xf32> to vector<16x1xf32>
    %cst_34 = arith.constant 3.200000e+01 : f32
    %96 = vector.broadcast %cst_34 : f32 to vector<16x1xf32>
    %97 = arith.divf %95, %96 : vector<16x1xf32>
    %98 = vector.broadcast %90 : vector<16x1xf32> to vector<16x32xf32>
    %99 = arith.subf %86, %98 : vector<16x32xf32>
    %cst_35 = arith.constant 9.99999974E-6 : f32
    %100 = vector.broadcast %cst_35 : f32 to vector<16x1xf32>
    %101 = arith.addf %97, %100 : vector<16x1xf32>
    %102 = math.rsqrt %101 : vector<16x1xf32>
    %103 = vector.broadcast %102 : vector<16x1xf32> to vector<16x32xf32>
    %104 = arith.mulf %99, %103 : vector<16x32xf32>
    %105 = vector.broadcast %38 : vector<1x32xf32> to vector<16x32xf32>
    %106 = arith.mulf %104, %105 : vector<16x32xf32>
    %107 = vector.broadcast %39 : vector<1x32xf32> to vector<16x32xf32>
    %108 = arith.addf %106, %107 : vector<16x32xf32>
    %c0_36 = arith.constant 0 : index
    %c0_37 = arith.constant 0 : index
    %c0_38 = arith.constant 0 : index
    %109 = vector.load %arg10[%c0_36, %c0_37, %c0_38] : memref<2x32x64xf32, #tpu.memory_space<vmem>>, vector<1x32x64xf32>
    %110 = vector.shape_cast %109 : vector<1x32x64xf32> to vector<32x64xf32>
    %cst_39 = arith.constant dense<0.000000e+00> : vector<16x64xf32>
    %111 = tpu.matmul %108, %110, %cst_39 {dimension_numbers = #tpu.dot_dimension_numbers<[1], [0], [0], [1], [0, 0, 1, 1], [], []>} : vector<16x32xf32>, vector<32x64xf32>, vector<16x64xf32> -> vector<16x64xf32>
    %112 = vector.broadcast %36 : vector<1x64xf32> to vector<16x64xf32>
    %113 = arith.addf %111, %112 : vector<16x64xf32>
    %cst_40 = arith.constant 0.000000e+00 : f32
    %114 = vector.broadcast %cst_40 : f32 to vector<16x64xf32>
    %115 = arith.maximumf %113, %114 : vector<16x64xf32>
    %c0_41 = arith.constant 0 : index
    %c0_42 = arith.constant 0 : index
    %c0_43 = arith.constant 0 : index
    %116 = vector.load %arg11[%c0_41, %c0_42, %c0_43] : memref<2x64x32xf32, #tpu.memory_space<vmem>>, vector<1x64x32xf32>
    %117 = vector.shape_cast %116 : vector<1x64x32xf32> to vector<64x32xf32>
    %cst_44 = arith.constant dense<0.000000e+00> : vector<16x32xf32>
    %118 = tpu.matmul %115, %117, %cst_44 {dimension_numbers = #tpu.dot_dimension_numbers<[1], [0], [0], [1], [0, 0, 1, 1], [], []>} : vector<16x64xf32>, vector<64x32xf32>, vector<16x32xf32> -> vector<16x32xf32>
    %119 = vector.broadcast %37 : vector<1x32xf32> to vector<16x32xf32>
    %120 = arith.addf %118, %119 : vector<16x32xf32>
    %121 = arith.addf %120, %108 : vector<16x32xf32>
    %cst_45 = arith.constant dense<0.000000e+00> : vector<16xf32>
    %122 = vector.multi_reduction <add>, %121, %cst_45 [1] : vector<16x32xf32> to vector<16xf32>
    %123 = vector.shape_cast %122 : vector<16xf32> to vector<16x1xf32>
    %cst_46 = arith.constant 3.200000e+01 : f32
    %124 = vector.broadcast %cst_46 : f32 to vector<16x1xf32>
    %125 = arith.divf %123, %124 : vector<16x1xf32>
    %126 = vector.broadcast %125 : vector<16x1xf32> to vector<16x32xf32>
    %127 = arith.subf %121, %126 : vector<16x32xf32>
    %128 = arith.mulf %127, %127 : vector<16x32xf32>
    %cst_47 = arith.constant dense<0.000000e+00> : vector<16xf32>
    %129 = vector.multi_reduction <add>, %128, %cst_47 [1] : vector<16x32xf32> to vector<16xf32>
    %130 = vector.shape_cast %129 : vector<16xf32> to vector<16x1xf32>
    %cst_48 = arith.constant 3.200000e+01 : f32
    %131 = vector.broadcast %cst_48 : f32 to vector<16x1xf32>
    %132 = arith.divf %130, %131 : vector<16x1xf32>
    %133 = vector.broadcast %125 : vector<16x1xf32> to vector<16x32xf32>
    %134 = arith.subf %121, %133 : vector<16x32xf32>
    %cst_49 = arith.constant 9.99999974E-6 : f32
    %135 = vector.broadcast %cst_49 : f32 to vector<16x1xf32>
    %136 = arith.addf %132, %135 : vector<16x1xf32>
    %137 = math.rsqrt %136 : vector<16x1xf32>
    %138 = vector.broadcast %137 : vector<16x1xf32> to vector<16x32xf32>
    %139 = arith.mulf %134, %138 : vector<16x32xf32>
    %140 = vector.broadcast %40 : vector<1x32xf32> to vector<16x32xf32>
    %141 = arith.mulf %139, %140 : vector<16x32xf32>
    %142 = vector.broadcast %41 : vector<1x32xf32> to vector<16x32xf32>
    %143 = arith.addf %141, %142 : vector<16x32xf32>
    %c1 = arith.constant 1 : index
    %c0_50 = arith.constant 0 : index
    %c0_51 = arith.constant 0 : index
    %144 = vector.load %arg12[%c1, %c0_50, %c0_51] : memref<2x8x128xf32, #tpu.memory_space<vmem>>, vector<1x8x128xf32>
    %145 = vector.shape_cast %144 : vector<1x8x128xf32> to vector<8x128xf32>
    %146 = vector.extract_strided_slice %145 {offsets = [0, 0], sizes = [1, 96], strides = [1, 1]} : vector<8x128xf32> to vector<1x96xf32>
    %147 = vector.extract_strided_slice %145 {offsets = [1, 0], sizes = [1, 32], strides = [1, 1]} : vector<8x128xf32> to vector<1x32xf32>
    %148 = vector.extract_strided_slice %145 {offsets = [2, 0], sizes = [1, 64], strides = [1, 1]} : vector<8x128xf32> to vector<1x64xf32>
    %149 = vector.extract_strided_slice %145 {offsets = [3, 0], sizes = [1, 32], strides = [1, 1]} : vector<8x128xf32> to vector<1x32xf32>
    %150 = vector.extract_strided_slice %145 {offsets = [4, 0], sizes = [1, 32], strides = [1, 1]} : vector<8x128xf32> to vector<1x32xf32>
    %151 = vector.extract_strided_slice %145 {offsets = [5, 0], sizes = [1, 32], strides = [1, 1]} : vector<8x128xf32> to vector<1x32xf32>
    %152 = vector.extract_strided_slice %145 {offsets = [6, 0], sizes = [1, 32], strides = [1, 1]} : vector<8x128xf32> to vector<1x32xf32>
    %153 = vector.extract_strided_slice %145 {offsets = [7, 0], sizes = [1, 32], strides = [1, 1]} : vector<8x128xf32> to vector<1x32xf32>
    %c1_52 = arith.constant 1 : index
    %c0_53 = arith.constant 0 : index
    %c0_54 = arith.constant 0 : index
    %154 = vector.load %arg8[%c1_52, %c0_53, %c0_54] : memref<2x32x96xf32, #tpu.memory_space<vmem>>, vector<1x32x96xf32>
    %155 = vector.shape_cast %154 : vector<1x32x96xf32> to vector<32x96xf32>
    %cst_55 = arith.constant dense<0.000000e+00> : vector<16x96xf32>
    %156 = tpu.matmul %143, %155, %cst_55 {dimension_numbers = #tpu.dot_dimension_numbers<[1], [0], [0], [1], [0, 0, 1, 1], [], []>} : vector<16x32xf32>, vector<32x96xf32>, vector<16x96xf32> -> vector<16x96xf32>
    %157 = vector.broadcast %146 : vector<1x96xf32> to vector<16x96xf32>
    %158 = arith.addf %156, %157 : vector<16x96xf32>
    %159 = vector.extract_strided_slice %158 {offsets = [0, 0], sizes = [16, 8], strides = [1, 1]} : vector<16x96xf32> to vector<16x8xf32>
    %160 = vector.extract_strided_slice %158 {offsets = [0, 8], sizes = [16, 8], strides = [1, 1]} : vector<16x96xf32> to vector<16x8xf32>
    %161 = vector.extract_strided_slice %158 {offsets = [0, 16], sizes = [16, 8], strides = [1, 1]} : vector<16x96xf32> to vector<16x8xf32>
    %162 = vector.extract_strided_slice %158 {offsets = [0, 24], sizes = [16, 8], strides = [1, 1]} : vector<16x96xf32> to vector<16x8xf32>
    %163 = tpu.concatenate %159, %160, %161, %162 in 0 : vector<16x8xf32>, vector<16x8xf32>, vector<16x8xf32>, vector<16x8xf32> -> vector<64x8xf32>
    %164 = vector.extract_strided_slice %158 {offsets = [0, 32], sizes = [16, 8], strides = [1, 1]} : vector<16x96xf32> to vector<16x8xf32>
    %165 = vector.extract_strided_slice %158 {offsets = [0, 40], sizes = [16, 8], strides = [1, 1]} : vector<16x96xf32> to vector<16x8xf32>
    %166 = vector.extract_strided_slice %158 {offsets = [0, 48], sizes = [16, 8], strides = [1, 1]} : vector<16x96xf32> to vector<16x8xf32>
    %167 = vector.extract_strided_slice %158 {offsets = [0, 56], sizes = [16, 8], strides = [1, 1]} : vector<16x96xf32> to vector<16x8xf32>
    %168 = tpu.concatenate %164, %165, %166, %167 in 0 : vector<16x8xf32>, vector<16x8xf32>, vector<16x8xf32>, vector<16x8xf32> -> vector<64x8xf32>
    %169 = vector.extract_strided_slice %158 {offsets = [0, 64], sizes = [16, 8], strides = [1, 1]} : vector<16x96xf32> to vector<16x8xf32>
    %170 = vector.extract_strided_slice %158 {offsets = [0, 72], sizes = [16, 8], strides = [1, 1]} : vector<16x96xf32> to vector<16x8xf32>
    %171 = vector.extract_strided_slice %158 {offsets = [0, 80], sizes = [16, 8], strides = [1, 1]} : vector<16x96xf32> to vector<16x8xf32>
    %172 = vector.extract_strided_slice %158 {offsets = [0, 88], sizes = [16, 8], strides = [1, 1]} : vector<16x96xf32> to vector<16x8xf32>
    %173 = tpu.concatenate %169, %170, %171, %172 in 0 : vector<16x8xf32>, vector<16x8xf32>, vector<16x8xf32>, vector<16x8xf32> -> vector<64x8xf32>
    %cst_56 = arith.constant dense<0.000000e+00> : vector<64x64xf32>
    %174 = tpu.matmul %163, %168, %cst_56 {dimension_numbers = #tpu.dot_dimension_numbers<[1], [1], [0], [0], [0, 0, 1, 0], [], []>} : vector<64x8xf32>, vector<64x8xf32>, vector<64x64xf32> -> vector<64x64xf32>
    %cst_57 = arith.constant 0.353553385 : f32
    %175 = vector.broadcast %cst_57 : f32 to vector<64x64xf32>
    %176 = arith.mulf %174, %175 : vector<64x64xf32>
    %177 = arith.addf %176, %31 : vector<64x64xf32>
    %cst_58 = arith.constant dense<0xFF800000> : vector<64xf32>
    %178 = vector.multi_reduction <maximumf>, %177, %cst_58 [1] : vector<64x64xf32> to vector<64xf32>
    %179 = vector.shape_cast %178 : vector<64xf32> to vector<64x1xf32>
    %180 = vector.broadcast %179 : vector<64x1xf32> to vector<64x64xf32>
    %181 = arith.subf %177, %180 : vector<64x64xf32>
    %182 = math.exp %181 : vector<64x64xf32>
    %cst_59 = arith.constant dense<0.000000e+00> : vector<64xf32>
    %183 = vector.multi_reduction <add>, %182, %cst_59 [1] : vector<64x64xf32> to vector<64xf32>
    %184 = vector.shape_cast %183 : vector<64xf32> to vector<64x1xf32>
    %185 = vector.broadcast %184 : vector<64x1xf32> to vector<64x64xf32>
    %186 = arith.divf %182, %185 : vector<64x64xf32>
    %cst_60 = arith.constant dense<0.000000e+00> : vector<64x8xf32>
    %187 = tpu.matmul %186, %173, %cst_60 {dimension_numbers = #tpu.dot_dimension_numbers<[1], [0], [0], [1], [0, 0, 1, 1], [], []>} : vector<64x64xf32>, vector<64x8xf32>, vector<64x8xf32> -> vector<64x8xf32>
    %188 = vector.extract_strided_slice %187 {offsets = [0, 0], sizes = [16, 8], strides = [1, 1]} : vector<64x8xf32> to vector<16x8xf32>
    %189 = vector.extract_strided_slice %187 {offsets = [16, 0], sizes = [16, 8], strides = [1, 1]} : vector<64x8xf32> to vector<16x8xf32>
    %190 = vector.extract_strided_slice %187 {offsets = [32, 0], sizes = [16, 8], strides = [1, 1]} : vector<64x8xf32> to vector<16x8xf32>
    %191 = vector.extract_strided_slice %187 {offsets = [48, 0], sizes = [16, 8], strides = [1, 1]} : vector<64x8xf32> to vector<16x8xf32>
    %192 = tpu.concatenate %188, %189, %190, %191 in 1 : vector<16x8xf32>, vector<16x8xf32>, vector<16x8xf32>, vector<16x8xf32> -> vector<16x32xf32>
    %c1_61 = arith.constant 1 : index
    %c0_62 = arith.constant 0 : index
    %c0_63 = arith.constant 0 : index
    %193 = vector.load %arg9[%c1_61, %c0_62, %c0_63] : memref<2x32x32xf32, #tpu.memory_space<vmem>>, vector<1x32x32xf32>
    %194 = vector.shape_cast %193 : vector<1x32x32xf32> to vector<32x32xf32>
    %cst_64 = arith.constant dense<0.000000e+00> : vector<16x32xf32>
    %195 = tpu.matmul %192, %194, %cst_64 {dimension_numbers = #tpu.dot_dimension_numbers<[1], [0], [0], [1], [0, 0, 1, 1], [], []>} : vector<16x32xf32>, vector<32x32xf32>, vector<16x32xf32> -> vector<16x32xf32>
    %196 = vector.broadcast %147 : vector<1x32xf32> to vector<16x32xf32>
    %197 = arith.addf %195, %196 : vector<16x32xf32>
    %198 = arith.addf %197, %143 : vector<16x32xf32>
    %cst_65 = arith.constant dense<0.000000e+00> : vector<16xf32>
    %199 = vector.multi_reduction <add>, %198, %cst_65 [1] : vector<16x32xf32> to vector<16xf32>
    %200 = vector.shape_cast %199 : vector<16xf32> to vector<16x1xf32>
    %cst_66 = arith.constant 3.200000e+01 : f32
    %201 = vector.broadcast %cst_66 : f32 to vector<16x1xf32>
    %202 = arith.divf %200, %201 : vector<16x1xf32>
    %203 = vector.broadcast %202 : vector<16x1xf32> to vector<16x32xf32>
    %204 = arith.subf %198, %203 : vector<16x32xf32>
    %205 = arith.mulf %204, %204 : vector<16x32xf32>
    %cst_67 = arith.constant dense<0.000000e+00> : vector<16xf32>
    %206 = vector.multi_reduction <add>, %205, %cst_67 [1] : vector<16x32xf32> to vector<16xf32>
    %207 = vector.shape_cast %206 : vector<16xf32> to vector<16x1xf32>
    %cst_68 = arith.constant 3.200000e+01 : f32
    %208 = vector.broadcast %cst_68 : f32 to vector<16x1xf32>
    %209 = arith.divf %207, %208 : vector<16x1xf32>
    %210 = vector.broadcast %202 : vector<16x1xf32> to vector<16x32xf32>
    %211 = arith.subf %198, %210 : vector<16x32xf32>
    %cst_69 = arith.constant 9.99999974E-6 : f32
    %212 = vector.broadcast %cst_69 : f32 to vector<16x1xf32>
    %213 = arith.addf %209, %212 : vector<16x1xf32>
    %214 = math.rsqrt %213 : vector<16x1xf32>
    %215 = vector.broadcast %214 : vector<16x1xf32> to vector<16x32xf32>
    %216 = arith.mulf %211, %215 : vector<16x32xf32>
    %217 = vector.broadcast %150 : vector<1x32xf32> to vector<16x32xf32>
    %218 = arith.mulf %216, %217 : vector<16x32xf32>
    %219 = vector.broadcast %151 : vector<1x32xf32> to vector<16x32xf32>
    %220 = arith.addf %218, %219 : vector<16x32xf32>
    %c1_70 = arith.constant 1 : index
    %c0_71 = arith.constant 0 : index
    %c0_72 = arith.constant 0 : index
    %221 = vector.load %arg10[%c1_70, %c0_71, %c0_72] : memref<2x32x64xf32, #tpu.memory_space<vmem>>, vector<1x32x64xf32>
    %222 = vector.shape_cast %221 : vector<1x32x64xf32> to vector<32x64xf32>
    %cst_73 = arith.constant dense<0.000000e+00> : vector<16x64xf32>
    %223 = tpu.matmul %220, %222, %cst_73 {dimension_numbers = #tpu.dot_dimension_numbers<[1], [0], [0], [1], [0, 0, 1, 1], [], []>} : vector<16x32xf32>, vector<32x64xf32>, vector<16x64xf32> -> vector<16x64xf32>
    %224 = vector.broadcast %148 : vector<1x64xf32> to vector<16x64xf32>
    %225 = arith.addf %223, %224 : vector<16x64xf32>
    %cst_74 = arith.constant 0.000000e+00 : f32
    %226 = vector.broadcast %cst_74 : f32 to vector<16x64xf32>
    %227 = arith.maximumf %225, %226 : vector<16x64xf32>
    %c1_75 = arith.constant 1 : index
    %c0_76 = arith.constant 0 : index
    %c0_77 = arith.constant 0 : index
    %228 = vector.load %arg11[%c1_75, %c0_76, %c0_77] : memref<2x64x32xf32, #tpu.memory_space<vmem>>, vector<1x64x32xf32>
    %229 = vector.shape_cast %228 : vector<1x64x32xf32> to vector<64x32xf32>
    %cst_78 = arith.constant dense<0.000000e+00> : vector<16x32xf32>
    %230 = tpu.matmul %227, %229, %cst_78 {dimension_numbers = #tpu.dot_dimension_numbers<[1], [0], [0], [1], [0, 0, 1, 1], [], []>} : vector<16x64xf32>, vector<64x32xf32>, vector<16x32xf32> -> vector<16x32xf32>
    %231 = vector.broadcast %149 : vector<1x32xf32> to vector<16x32xf32>
    %232 = arith.addf %230, %231 : vector<16x32xf32>
    %233 = arith.addf %232, %220 : vector<16x32xf32>
    %cst_79 = arith.constant dense<0.000000e+00> : vector<16xf32>
    %234 = vector.multi_reduction <add>, %233, %cst_79 [1] : vector<16x32xf32> to vector<16xf32>
    %235 = vector.shape_cast %234 : vector<16xf32> to vector<16x1xf32>
    %cst_80 = arith.constant 3.200000e+01 : f32
    %236 = vector.broadcast %cst_80 : f32 to vector<16x1xf32>
    %237 = arith.divf %235, %236 : vector<16x1xf32>
    %238 = vector.broadcast %237 : vector<16x1xf32> to vector<16x32xf32>
    %239 = arith.subf %233, %238 : vector<16x32xf32>
    %240 = arith.mulf %239, %239 : vector<16x32xf32>
    %cst_81 = arith.constant dense<0.000000e+00> : vector<16xf32>
    %241 = vector.multi_reduction <add>, %240, %cst_81 [1] : vector<16x32xf32> to vector<16xf32>
    %242 = vector.shape_cast %241 : vector<16xf32> to vector<16x1xf32>
    %cst_82 = arith.constant 3.200000e+01 : f32
    %243 = vector.broadcast %cst_82 : f32 to vector<16x1xf32>
    %244 = arith.divf %242, %243 : vector<16x1xf32>
    %245 = vector.broadcast %237 : vector<16x1xf32> to vector<16x32xf32>
    %246 = arith.subf %233, %245 : vector<16x32xf32>
    %cst_83 = arith.constant 9.99999974E-6 : f32
    %247 = vector.broadcast %cst_83 : f32 to vector<16x1xf32>
    %248 = arith.addf %244, %247 : vector<16x1xf32>
    %249 = math.rsqrt %248 : vector<16x1xf32>
    %250 = vector.broadcast %249 : vector<16x1xf32> to vector<16x32xf32>
    %251 = arith.mulf %246, %250 : vector<16x32xf32>
    %252 = vector.broadcast %152 : vector<1x32xf32> to vector<16x32xf32>
    %253 = arith.mulf %251, %252 : vector<16x32xf32>
    %254 = vector.broadcast %153 : vector<1x32xf32> to vector<16x32xf32>
    %255 = arith.addf %253, %254 : vector<16x32xf32>
    %c0_84 = arith.constant 0 : index
    %c0_85 = arith.constant 0 : index
    %256 = vector.load %arg14[%c0_84, %c0_85] : memref<8x128xf32, #tpu.memory_space<vmem>>, vector<8x128xf32>
    %257 = vector.extract_strided_slice %255 {offsets = [0, 0], sizes = [1, 32], strides = [1, 1]} : vector<16x32xf32> to vector<1x32xf32>
    %258 = vector.extract_strided_slice %255 {offsets = [8, 0], sizes = [1, 32], strides = [1, 1]} : vector<16x32xf32> to vector<1x32xf32>
    %259 = tpu.concatenate %257, %258 in 0 : vector<1x32xf32>, vector<1x32xf32> -> vector<2x32xf32>
    %c0_86 = arith.constant 0 : index
    %c0_87 = arith.constant 0 : index
    %c0_88 = arith.constant 0 : index
    %260 = vector.load %arg13[%c0_86, %c0_87, %c0_88] : memref<4x32x32xf32, #tpu.memory_space<vmem>>, vector<1x32x32xf32>
    %261 = vector.shape_cast %260 : vector<1x32x32xf32> to vector<32x32xf32>
    %cst_89 = arith.constant dense<0.000000e+00> : vector<2x32xf32>
    %262 = tpu.matmul %259, %261, %cst_89 {dimension_numbers = #tpu.dot_dimension_numbers<[1], [0], [0], [1], [0, 0, 1, 1], [], []>} : vector<2x32xf32>, vector<32x32xf32>, vector<2x32xf32> -> vector<2x32xf32>
    %263 = vector.extract_strided_slice %256 {offsets = [0, 0], sizes = [1, 32], strides = [1, 1]} : vector<8x128xf32> to vector<1x32xf32>
    %264 = vector.broadcast %263 : vector<1x32xf32> to vector<2x32xf32>
    %265 = arith.addf %262, %264 : vector<2x32xf32>
    %266 = math.tanh %265 : vector<2x32xf32>
    %c1_90 = arith.constant 1 : index
    %c0_91 = arith.constant 0 : index
    %c0_92 = arith.constant 0 : index
    %267 = vector.load %arg13[%c1_90, %c0_91, %c0_92] : memref<4x32x32xf32, #tpu.memory_space<vmem>>, vector<1x32x32xf32>
    %268 = vector.shape_cast %267 : vector<1x32x32xf32> to vector<32x32xf32>
    %cst_93 = arith.constant dense<0.000000e+00> : vector<2x32xf32>
    %269 = tpu.matmul %266, %268, %cst_93 {dimension_numbers = #tpu.dot_dimension_numbers<[1], [0], [0], [1], [0, 0, 1, 1], [], []>} : vector<2x32xf32>, vector<32x32xf32>, vector<2x32xf32> -> vector<2x32xf32>
    %270 = vector.extract_strided_slice %269 {offsets = [0, 0], sizes = [2, 4], strides = [1, 1]} : vector<2x32xf32> to vector<2x4xf32>
    %271 = vector.extract_strided_slice %256 {offsets = [1, 0], sizes = [1, 4], strides = [1, 1]} : vector<8x128xf32> to vector<1x4xf32>
    %272 = vector.broadcast %271 : vector<1x4xf32> to vector<2x4xf32>
    %273 = arith.addf %270, %272 : vector<2x4xf32>
    %c0_94 = arith.constant 0 : index
    %c0_95 = arith.constant 0 : index
    %274 = vector.load %arg16[%c0_94, %c0_95] : memref<2x4xf32, #tpu.memory_space<vmem>>, vector<2x4xf32>
    tpu.vector_store %arg16[%c0_94, %c0_95], %273 {strides = array<i32>} : memref<2x4xf32, #tpu.memory_space<vmem>>, vector<2x4xf32>,
    %c0_96 = arith.constant 0 : index
    %c0_97 = arith.constant 0 : index
    %275 = vector.load %arg2[%c0_96, %c0_97] : memref<16x1xi32, #tpu.memory_space<vmem>>, vector<16x1xi32>
    %c0_i32_98 = arith.constant 0 : i32
    %276 = vector.broadcast %c0_i32_98 : i32 to vector<16x1xi32>
    %277 = arith.cmpi eq, %275, %276 : vector<16x1xi32>
    %278 = arith.extui %277 : vector<16x1xi1> to vector<16x1xi32>
    %279 = arith.sitofp %278 : vector<16x1xi32> to vector<16x1xf32>
    %280 = vector.broadcast %279 : vector<16x1xf32> to vector<16x32xf32>
    %281 = arith.mulf %255, %280 : vector<16x32xf32>
    %c2 = arith.constant 2 : index
    %c0_99 = arith.constant 0 : index
    %c0_100 = arith.constant 0 : index
    %282 = vector.load %arg13[%c2, %c0_99, %c0_100] : memref<4x32x32xf32, #tpu.memory_space<vmem>>, vector<1x32x32xf32>
    %283 = vector.shape_cast %282 : vector<1x32x32xf32> to vector<32x32xf32>
    %cst_101 = arith.constant dense<0.000000e+00> : vector<16x32xf32>
    %284 = tpu.matmul %281, %283, %cst_101 {dimension_numbers = #tpu.dot_dimension_numbers<[1], [0], [0], [1], [0, 0, 1, 1], [], []>} : vector<16x32xf32>, vector<32x32xf32>, vector<16x32xf32> -> vector<16x32xf32>
    %285 = vector.extract_strided_slice %256 {offsets = [2, 0], sizes = [1, 32], strides = [1, 1]} : vector<8x128xf32> to vector<1x32xf32>
    %286 = vector.broadcast %285 : vector<1x32xf32> to vector<16x32xf32>
    %287 = arith.addf %284, %286 : vector<16x32xf32>
    %cst_102 = arith.constant 5.000000e-01 : f32
    %288 = vector.broadcast %cst_102 : f32 to vector<16x32xf32>
    %289 = arith.mulf %287, %288 : vector<16x32xf32>
    %cst_103 = arith.constant 0.707106769 : f32
    %290 = vector.broadcast %cst_103 : f32 to vector<16x32xf32>
    %291 = arith.mulf %287, %290 : vector<16x32xf32>
    %292 = math.absf %291 : vector<16x32xf32>
    %cst_104 = arith.constant 0.327591091 : f32
    %293 = vector.broadcast %cst_104 : f32 to vector<16x32xf32>
    %294 = arith.mulf %293, %292 : vector<16x32xf32>
    %cst_105 = arith.constant 1.000000e+00 : f32
    %295 = vector.broadcast %cst_105 : f32 to vector<16x32xf32>
    %296 = arith.addf %295, %294 : vector<16x32xf32>
    %cst_106 = arith.constant 1.000000e+00 : f32
    %297 = vector.broadcast %cst_106 : f32 to vector<16x32xf32>
    %298 = arith.divf %297, %296 : vector<16x32xf32>
    %cst_107 = arith.constant 1.06140542 : f32
    %299 = vector.broadcast %cst_107 : f32 to vector<16x32xf32>
    %300 = arith.mulf %298, %299 : vector<16x32xf32>
    %cst_108 = arith.constant -1.45315206 : f32
    %301 = vector.broadcast %cst_108 : f32 to vector<16x32xf32>
    %302 = arith.addf %301, %300 : vector<16x32xf32>
    %303 = arith.mulf %298, %302 : vector<16x32xf32>
    %cst_109 = arith.constant 1.42141378 : f32
    %304 = vector.broadcast %cst_109 : f32 to vector<16x32xf32>
    %305 = arith.addf %304, %303 : vector<16x32xf32>
    %306 = arith.mulf %298, %305 : vector<16x32xf32>
    %cst_110 = arith.constant -0.284496725 : f32
    %307 = vector.broadcast %cst_110 : f32 to vector<16x32xf32>
    %308 = arith.addf %307, %306 : vector<16x32xf32>
    %309 = arith.mulf %298, %308 : vector<16x32xf32>
    %cst_111 = arith.constant 0.254829586 : f32
    %310 = vector.broadcast %cst_111 : f32 to vector<16x32xf32>
    %311 = arith.addf %310, %309 : vector<16x32xf32>
    %312 = arith.mulf %298, %311 : vector<16x32xf32>
    %cst_112 = arith.constant 0.000000e+00 : f32
    %313 = vector.broadcast %cst_112 : f32 to vector<16x32xf32>
    %314 = arith.subf %313, %292 : vector<16x32xf32>
    %315 = arith.mulf %314, %292 : vector<16x32xf32>
    %316 = math.exp %315 : vector<16x32xf32>
    %317 = arith.mulf %312, %316 : vector<16x32xf32>
    %cst_113 = arith.constant 1.000000e+00 : f32
    %318 = vector.broadcast %cst_113 : f32 to vector<16x32xf32>
    %319 = arith.subf %318, %317 : vector<16x32xf32>
    %cst_114 = arith.constant 0.000000e+00 : f32
    %320 = vector.broadcast %cst_114 : f32 to vector<16x32xf32>
    %321 = arith.cmpf olt, %291, %320 : vector<16x32xf32>
    %cst_115 = arith.constant 0.000000e+00 : f32
    %322 = vector.broadcast %cst_115 : f32 to vector<16x32xf32>
    %323 = arith.subf %322, %319 : vector<16x32xf32>
    %324 = arith.select %321, %323, %319 : vector<16x32xi1>, vector<16x32xf32>
    %cst_116 = arith.constant 1.000000e+00 : f32
    %325 = vector.broadcast %cst_116 : f32 to vector<16x32xf32>
    %326 = arith.addf %325, %324 : vector<16x32xf32>
    %327 = arith.mulf %289, %326 : vector<16x32xf32>
    %328 = vector.extract_strided_slice %256 {offsets = [3, 0], sizes = [1, 32], strides = [1, 1]} : vector<8x128xf32> to vector<1x32xf32>
    %329 = vector.extract_strided_slice %256 {offsets = [4, 0], sizes = [1, 32], strides = [1, 1]} : vector<8x128xf32> to vector<1x32xf32>
    %cst_117 = arith.constant dense<0.000000e+00> : vector<16xf32>
    %330 = vector.multi_reduction <add>, %327, %cst_117 [1] : vector<16x32xf32> to vector<16xf32>
    %331 = vector.shape_cast %330 : vector<16xf32> to vector<16x1xf32>
    %cst_118 = arith.constant 3.200000e+01 : f32
    %332 = vector.broadcast %cst_118 : f32 to vector<16x1xf32>
    %333 = arith.divf %331, %332 : vector<16x1xf32>
    %334 = vector.broadcast %333 : vector<16x1xf32> to vector<16x32xf32>
    %335 = arith.subf %327, %334 : vector<16x32xf32>
    %336 = arith.mulf %335, %335 : vector<16x32xf32>
    %cst_119 = arith.constant dense<0.000000e+00> : vector<16xf32>
    %337 = vector.multi_reduction <add>, %336, %cst_119 [1] : vector<16x32xf32> to vector<16xf32>
    %338 = vector.shape_cast %337 : vector<16xf32> to vector<16x1xf32>
    %cst_120 = arith.constant 3.200000e+01 : f32
    %339 = vector.broadcast %cst_120 : f32 to vector<16x1xf32>
    %340 = arith.divf %338, %339 : vector<16x1xf32>
    %341 = vector.broadcast %333 : vector<16x1xf32> to vector<16x32xf32>
    %342 = arith.subf %327, %341 : vector<16x32xf32>
    %cst_121 = arith.constant 9.99999974E-6 : f32
    %343 = vector.broadcast %cst_121 : f32 to vector<16x1xf32>
    %344 = arith.addf %340, %343 : vector<16x1xf32>
    %345 = math.rsqrt %344 : vector<16x1xf32>
    %346 = vector.broadcast %345 : vector<16x1xf32> to vector<16x32xf32>
    %347 = arith.mulf %342, %346 : vector<16x32xf32>
    %348 = vector.broadcast %328 : vector<1x32xf32> to vector<16x32xf32>
    %349 = arith.mulf %347, %348 : vector<16x32xf32>
    %350 = vector.broadcast %329 : vector<1x32xf32> to vector<16x32xf32>
    %351 = arith.addf %349, %350 : vector<16x32xf32>
    %c3 = arith.constant 3 : index
    %c0_122 = arith.constant 0 : index
    %c0_123 = arith.constant 0 : index
    %352 = vector.load %arg13[%c3, %c0_122, %c0_123] : memref<4x32x32xf32, #tpu.memory_space<vmem>>, vector<1x32x32xf32>
    %353 = vector.shape_cast %352 : vector<1x32x32xf32> to vector<32x32xf32>
    %cst_124 = arith.constant dense<0.000000e+00> : vector<16x32xf32>
    %354 = tpu.matmul %351, %353, %cst_124 {dimension_numbers = #tpu.dot_dimension_numbers<[1], [0], [0], [1], [0, 0, 1, 1], [], []>} : vector<16x32xf32>, vector<32x32xf32>, vector<16x32xf32> -> vector<16x32xf32>
    %355 = vector.extract_strided_slice %354 {offsets = [0, 0], sizes = [16, 12], strides = [1, 1]} : vector<16x32xf32> to vector<16x12xf32>
    %356 = vector.extract_strided_slice %256 {offsets = [5, 0], sizes = [1, 12], strides = [1, 1]} : vector<8x128xf32> to vector<1x12xf32>
    %357 = vector.broadcast %356 : vector<1x12xf32> to vector<16x12xf32>
    %358 = arith.addf %355, %357 : vector<16x12xf32>
    %359 = vector.broadcast %279 : vector<16x1xf32> to vector<16x12xf32>
    %360 = arith.mulf %358, %359 : vector<16x12xf32>
    %c0_125 = arith.constant 0 : index
    %c0_126 = arith.constant 0 : index
    %361 = vector.load %arg15[%c0_125, %c0_126] : memref<16x12xf32, #tpu.memory_space<vmem>>, vector<16x12xf32>
    tpu.vector_store %arg15[%c0_125, %c0_126], %360 {strides = array<i32>} : memref<16x12xf32, #tpu.memory_space<vmem>>, vector<16x12xf32>,
    return
  }
  func.func @transform_0(%arg0: i32) -> (i32, i32) {
    %c0_i32 = arith.constant 0 : i32
    %c0_i32_0 = arith.constant 0 : i32
    %c0_i32_1 = arith.constant 0 : i32
    return %c0_i32, %c0_i32_0 : i32, i32
  }
  func.func @transform_1(%arg0: i32) -> (i32, i32) {
    %c0_i32 = arith.constant 0 : i32
    %c0_i32_0 = arith.constant 0 : i32
    %c0_i32_1 = arith.constant 0 : i32
    return %c0_i32, %c0_i32_0 : i32, i32
  }
  func.func @transform_2(%arg0: i32) -> (i32, i32) {
    %c0_i32 = arith.constant 0 : i32
    %c0_i32_0 = arith.constant 0 : i32
    %c0_i32_1 = arith.constant 0 : i32
    return %c0_i32, %c0_i32_0 : i32, i32
  }
  func.func @transform_3(%arg0: i32) -> (i32, i32) {
    %c0_i32 = arith.constant 0 : i32
    %c0_i32_0 = arith.constant 0 : i32
    %c0_i32_1 = arith.constant 0 : i32
    return %c0_i32, %c0_i32_0 : i32, i32
  }
  func.func @transform_4(%arg0: i32) -> (i32, i32) {
    %c0_i32 = arith.constant 0 : i32
    %c0_i32_0 = arith.constant 0 : i32
    %c0_i32_1 = arith.constant 0 : i32
    return %c0_i32, %c0_i32_0 : i32, i32
  }
  func.func @transform_5(%arg0: i32) -> (i32, i32) {
    %c0_i32 = arith.constant 0 : i32
    %c0_i32_0 = arith.constant 0 : i32
    %c0_i32_1 = arith.constant 0 : i32
    return %c0_i32, %c0_i32_0 : i32, i32
  }
  func.func @transform_6(%arg0: i32) -> (i32, i32) {
    %c0_i32 = arith.constant 0 : i32
    %c0_i32_0 = arith.constant 0 : i32
    %c0_i32_1 = arith.constant 0 : i32
    return %c0_i32, %c0_i32_0 : i32, i32
  }
  func.func @transform_7(%arg0: i32) -> (i32, i32, i32) {
    %c0_i32 = arith.constant 0 : i32
    %c0_i32_0 = arith.constant 0 : i32
    %c0_i32_1 = arith.constant 0 : i32
    %c0_i32_2 = arith.constant 0 : i32
    return %c0_i32, %c0_i32_0, %c0_i32_1 : i32, i32, i32
  }
  func.func @transform_8(%arg0: i32) -> (i32, i32, i32) {
    %c0_i32 = arith.constant 0 : i32
    %c0_i32_0 = arith.constant 0 : i32
    %c0_i32_1 = arith.constant 0 : i32
    %c0_i32_2 = arith.constant 0 : i32
    return %c0_i32, %c0_i32_0, %c0_i32_1 : i32, i32, i32
  }
  func.func @transform_9(%arg0: i32) -> (i32, i32, i32) {
    %c0_i32 = arith.constant 0 : i32
    %c0_i32_0 = arith.constant 0 : i32
    %c0_i32_1 = arith.constant 0 : i32
    %c0_i32_2 = arith.constant 0 : i32
    return %c0_i32, %c0_i32_0, %c0_i32_1 : i32, i32, i32
  }
  func.func @transform_10(%arg0: i32) -> (i32, i32, i32) {
    %c0_i32 = arith.constant 0 : i32
    %c0_i32_0 = arith.constant 0 : i32
    %c0_i32_1 = arith.constant 0 : i32
    %c0_i32_2 = arith.constant 0 : i32
    return %c0_i32, %c0_i32_0, %c0_i32_1 : i32, i32, i32
  }
  func.func @transform_11(%arg0: i32) -> (i32, i32, i32) {
    %c0_i32 = arith.constant 0 : i32
    %c0_i32_0 = arith.constant 0 : i32
    %c0_i32_1 = arith.constant 0 : i32
    %c0_i32_2 = arith.constant 0 : i32
    return %c0_i32, %c0_i32_0, %c0_i32_1 : i32, i32, i32
  }
  func.func @transform_12(%arg0: i32) -> (i32, i32, i32) {
    %c0_i32 = arith.constant 0 : i32
    %c0_i32_0 = arith.constant 0 : i32
    %c0_i32_1 = arith.constant 0 : i32
    %c0_i32_2 = arith.constant 0 : i32
    return %c0_i32, %c0_i32_0, %c0_i32_1 : i32, i32, i32
  }
  func.func @transform_13(%arg0: i32) -> (i32, i32) {
    %c0_i32 = arith.constant 0 : i32
    %c0_i32_0 = arith.constant 0 : i32
    %c0_i32_1 = arith.constant 0 : i32
    return %c0_i32, %c0_i32_0 : i32, i32
  }
  func.func @transform_14(%arg0: i32) -> (i32, i32) {
    %c0_i32 = arith.constant 0 : i32
    %c0_i32_0 = arith.constant 0 : i32
    %c0_i32_1 = arith.constant 0 : i32
    return %c0_i32, %c0_i32_0 : i32, i32
  }
  func.func @transform_15(%arg0: i32) -> (i32, i32) {
    %c0_i32 = arith.constant 0 : i32
    %c0_i32_0 = arith.constant 0 : i32
    %c0_i32_1 = arith.constant 0 : i32
    return %c0_i32, %c0_i32_0 : i32, i32
  }
}

</mosaic_0001>

<bundles_post_ra>
// kernel: transformer_mix_forward.1
= control target key start
LH: loop header
LB: loop body
LE: loop exit
PB: predicated region body
PF: predicated region fallthrough
CT: control target
= control target key end

     0   :  { %21 = vsyncpa [#allocation3], 0  ;;  %s4372_s0 = inlined_call_operand.vmem [shape: s32[16,1], index: 0, kind: input, shape index: {}]   ;;  %s4373_s1 = inlined_call_operand.vmem [shape: s32[16,1], index: 1, kind: input, shape index: {}]   ;;  %s4374_s2 = inlined_call_operand.vmem [shape: s32[1,16], index: 2, kind: input, shape index: {}]   ;;  %s4375_s3 = inlined_call_operand.vmem [shape: f32[50,16], index: 3, kind: input, shape index: {}]   ;;  %s4376_s4 = inlined_call_operand.hbm [shape: f32[8,32], index: 4, kind: input, shape index: {}]   ;;  %s4377_s5 = inlined_call_operand.hbm [shape: f32[16,32], index: 5, kind: input, shape index: {}]   ;;  %s4378_s6 = inlined_call_operand.hbm [shape: f32[1,32], index: 6, kind: input, shape index: {}]   ;;  %s4379_s7 = inlined_call_operand.vmem [shape: f32[2,32,96], index: 7, kind: input, shape index: {}]   ;;  %s4380_s8 = inlined_call_operand.vmem [shape: f32[2,32,32], index: 8, kind: input, shape index: {}]   ;;  %s4381_s9 = inlined_call_operand.hbm [shape: f32[2,32,64], index: 9, kind: input, shape index: {}]   ;;  %s4382_s10 = inlined_call_operand.vmem [shape: f32[2,64,32], index: 10, kind: input, shape index: {}]   ;;  %s4383_s11 = inlined_call_operand.hbm [shape: f32[2,8,128], index: 11, kind: input, shape index: {}]   ;;  %s4384_s12 = inlined_call_operand.vmem [shape: f32[4,32,32], index: 12, kind: input, shape index: {}]   ;;  %s4385_s13 = inlined_call_operand.hbm [shape: f32[8,128], index: 13, kind: input, shape index: {}]   ;;  %s4386_s14 = inlined_call_operand.vmem [shape: f32[16,12], index: 14, kind: output, shape index: {0}]   ;;  %s4387_s15 = inlined_call_operand.hbm [shape: f32[2,4], index: 15, kind: output, shape index: {1}]  }
   0x1   :  { %22 = vsyncpa [#allocation6], 0 }
   0x2   :  { %23 = vsyncpa [#allocation9], 0 }
   0x3   :  { %24 = vsyncpa [#allocation12], 0 }
   0x4   :  { %25 = vsyncpa [#allocation4], 0  ;;  %s3510_s18 = smov [#allocation5]  }
   0x5   :  { %s49_s19 = sshll.u32 %s3510_s18, 4  ;;  %s50_s19 = int_to_ptr.vmem [resolvable:$true] %s49_s19 }
   0x6   :  { %s3368_s20 = scalar_lea.vmem %s50_s19, 256  ;;  %p3373_p1 = scmp.lt.s32.totalorder %s50_s19, %s50_s19 }
   0x7   :  { %p3369_p0 = scmp.ne.s32.totalorder %s50_s19, %s3368_s20  ;;  %p3374_p2 = scmp.lt.s32.totalorder %s3368_s20, %s3368_s20 }
   0x9   :  { %p3375_p3 = por %p3374_p2, %p3373_p1 }
   0xb   :  { %p3376_p4 = pnand %p3375_p3, %p3369_p0 }
   0xd   :  { %3379 = shalt.err (!%p3376_p4)
}
   0xe   :  { %s3511_s21 = smov 128   ;;  %s3512_s22 = smov 8  }
   0xf   :  { %55 = dma.hbm_to_vmem [thread:$0]  %s4377_s5, 256, %s50_s19, [#allocation6], %s3511_s21, %s3511_s21, %s3512_s22  }
  0x10   :  { %s3513_s25 = smov [#allocation8]   ;;  %s3514_s27 = smov [#allocation2]  }
  0x11   :  { %s75_s26 = sshll.u32 %s3513_s25, 4  ;;  %s40_s28 = sshll.u32 %s3514_s27, 4  ;;  %s76_s26 = int_to_ptr.vmem [resolvable:$true] %s75_s26  ;;  %s41_s28 = int_to_ptr.vmem [resolvable:$true] %s40_s28 }
  0x12   :  { %s3388_s29 = scalar_lea.vmem %s76_s26, 1024  ;;  %p3393_p6 = scmp.lt.s32.totalorder %s76_s26, %s76_s26 }
  0x13   :  { %p3389_p5 = scmp.ne.s32.totalorder %s76_s26, %s3388_s29  ;;  %p3394_p7 = scmp.lt.s32.totalorder %s3388_s29, %s3388_s29 }
  0x15   :  { %p3395_p8 = por %p3394_p7, %p3393_p6 }
  0x17   :  { %p3396_p9 = pnand %p3395_p8, %p3389_p5 }
  0x19   :  { %3399 = shalt.err (!%p3396_p9)
}
  0x1a   :  { %81 = dma.hbm_to_vmem [thread:$0]  %s4381_s9, 1024, %s76_s26, [#allocation9], %s3511_s21, %s3511_s21, %s3512_s22  }
  0x1b   :  { %s3408_s5 = scalar_lea.vmem %s41_s28, 128  ;;  %p3413_p11 = scmp.lt.s32.totalorder %s41_s28, %s41_s28 }
  0x1c   :  { %p3409_p10 = scmp.ne.s32.totalorder %s41_s28, %s3408_s5  ;;  %p3414_p12 = scmp.lt.s32.totalorder %s3408_s5, %s3408_s5 }
  0x1e   :  { %p3415_p13 = por %p3414_p12, %p3413_p11 }
  0x20   :  { %p3416_p0 = pnand %p3415_p13, %p3409_p10 }
  0x22   :  { %3419 = shalt.err (!%p3416_p0)
}
  0x23   :  { %43 = dma.hbm_to_vmem [thread:$0]  %s4376_s4, 128, %s41_s28, [#allocation3]  }
  0x24   :  { %s3515_s19 = smov [#allocation7]   ;;  %s3516_s23 = smov [#allocation10]  }
  0x25   :  { %s62_s20 = sshll.u32 %s3515_s19, 4  ;;  %s89_s24 = sshll.u32 %s3516_s23, 4  ;;  %s63_s20 = int_to_ptr.vmem [resolvable:$true] %s62_s20  ;;  %s90_s24 = int_to_ptr.vmem [resolvable:$true] %s89_s24 }
  0x26   :  { %s3428_s25 = scalar_lea.vmem %s63_s20, 16  ;;  %s3432_s9 = scalar_lea.vmem %s63_s20, 32 }
  0x27   :  { %p3429_p1 = scmp.ne.s32.totalorder %s63_s20, %s3428_s25  ;;  %p3433_p2 = scmp.lt.s32.totalorder %s63_s20, %s63_s20 }
  0x28   :  { %p3434_p3 = scmp.lt.s32.totalorder %s3432_s9, %s3428_s25 }
  0x2a   :  { %p3435_p4 = por %p3434_p3, %p3433_p2 }
  0x2c   :  { %p3436_p5 = pnand %p3435_p4, %p3429_p1 }
  0x2e   :  { %3439 = shalt.err (!%p3436_p5)
}
  0x2f   :  { %65 = dma.hbm_to_vmem [thread:$0]  %s4378_s6, 16, %s63_s20, [#allocation6]  }
  0x30   :  { %s3448_s29 = scalar_lea.vmem %s90_s24, 256  ;;  %p3453_p7 = scmp.lt.s32.totalorder %s90_s24, %s90_s24 }
  0x31   :  { %p3449_p6 = scmp.ne.s32.totalorder %s90_s24, %s3448_s29  ;;  %p3454_p8 = scmp.lt.s32.totalorder %s3448_s29, %s3448_s29 }
  0x33   :  { %p3455_p9 = por %p3454_p8, %p3453_p7 }
  0x35   :  { %p3456_p10 = pnand %p3455_p9, %p3449_p6 }
  0x37   :  { %3459 = shalt.err (!%p3456_p10)
}
  0x38   :  { %95 = dma.hbm_to_vmem [thread:$0]  %s4383_s11, 256, %s90_s24, [#allocation9], %s3511_s21, %s3511_s21, %s3512_s22  }
  0x39   :  { %s3517_s30 = smov [#allocation11]  }
  0x3a   :  { %s104_s16 = sshll.u32 %s3517_s30, 4  ;;  %s105_s16 = int_to_ptr.vmem [resolvable:$true] %s104_s16 }
  0x3b   :  { %s3468_s5 = scalar_lea.vmem %s105_s16, 128  ;;  %p3473_p12 = scmp.lt.s32.totalorder %s105_s16, %s105_s16 }
  0x3c   :  { %p3469_p11 = scmp.ne.s32.totalorder %s105_s16, %s3468_s5  ;;  %p3474_p13 = scmp.lt.s32.totalorder %s3468_s5, %s3468_s5 }
  0x3e   :  { %p3475_p0 = por %p3474_p13, %p3473_p12 }
  0x40   :  { %p3476_p1 = pnand %p3475_p0, %p3469_p11 }
  0x42   :  { %3479 = shalt.err (!%p3476_p1)
}
  0x43   :  { %107 = dma.hbm_to_vmem [thread:$0]  %s4385_s13, 128, %s105_s16, [#allocation12]  }
  0x44   :  { %3500 = dma.done.wait [#allocation3], 128  }
  0x45   :  { %3501 = vsyncadd [#allocation3], 4294967168 }
  0x46   :  { %3502 = dma.done.wait [#allocation6], 272  }
  0x47   :  { %3503 = vsyncadd [#allocation6], 4294967024 }
  0x48   :  { %3504 = dma.done.wait [#allocation9], 1280  }
  0x49   :  { %3505 = vsyncadd [#allocation9], 4294966016 }
  0x4a   :  { %3506 = dma.done.wait [#allocation12], 128  }
  0x4b   :  { %3507 = vsyncadd [#allocation12], 4294967168  ;;  %v3518_v0 = vmov 0   ;;  %vm156_vm0 = vcmask 1041408   ;;  %v126_v1 = vld [vmem:[%s4372_s0] sm:$0xff]  ;;  %v147_v3 = vld [vmem:[%s4375_s3 + $0x28] sm:$0xff]  ;;  %v128_v11 = vlaneseq }
  0x4c   :  { %3260 = vset.pattern.permute.xlu0 %v3518_v0  ;;  %v148_v2 = vld [vmem:[%s4375_s3 + $0x30] sm:$0x3]  ;;  %v127_v4 = vld [vmem:[%s4372_s0 + $0x8] sm:$0xff]  ;;  %v146_v5 = vld [vmem:[%s4375_s3 + $0x20] sm:$0xff]  ;;  %vm149_vm1 = vcmask 408576   ;;  %v3519_v14 = vmov 0.0  }
  0x4d   :  { %131 = vperm.xlu0 %3260, %v126_v1   ;;  %2954 = vmatprep.subr.msk.mxu0 %vm156_vm0, %v148_v2  ;;  %v145_v6 = vld [vmem:[%s4375_s3 + $0x18] sm:$0xff]  ;;  %v144_v7 = vld [vmem:[%s4375_s3 + $0x10] sm:$0xff]  ;;  %v143_v8 = vld [vmem:[%s4375_s3 + $0x8] sm:$0xff]  ;;  %v3667_v12 = vand.u32 127, %v128_v11  ;;  %vm245_vm4 = vcmask 130048   ;;  %vm341_vm5 = vcmask 261120  }
  0x4e   :  { %2955 = vmatpush3.msk.msra.mxu0 %vm156_vm0, %v148_v2  ;;  %v142_v9 = vld [vmem:[%s4375_s3] sm:$0xff]  ;;  %v237_v10 = vld [vmem:[#allocation5 + $0x8] sm:$0xff]  ;;  %v236_v18 = vld [vmem:[#allocation5] sm:$0xff]  ;;  %v3695_v33 = vshrl.u32 %v128_v11, 7  ;;  %vm514_vm6 = vcmask 64512   ;;  %s3520_s13 = smov 112  }
  0x4f   :  { %2956 = vmatprep.subr.mxu0 %v147_v3  ;;  %v398_v21 = vld [vmem:[%s4379_s7 + $0x18] sm:$0xff]  ;;  %v397_v22 = vld [vmem:[%s4379_s7 + $0x10] sm:$0xff]  ;;  %v396_v23 = vld [vmem:[%s4379_s7 + $0x8] sm:$0xff]  ;;  %s3521_s20 = smov 104   ;;  %s3522_s23 = smov 120   ;;  %vm343_vm7 = vcmask 392192  }
  0x50   :  { %2957 = vmatpush3.msra.mxu0 %v147_v3  ;;  %2978 = vmatprep.subr.mxu1 %v398_v21  ;;  %v395_v24 = vld [vmem:[%s4379_s7] sm:$0xff]  ;;  %v2696_v25 = vld [vmem:[#allocation7] ss:$0 sm:$0xff]  ;;  %v3698_v34 = vsub.s32 0, %v3695_v33  ;;  %s3523_s24 = smov 96   ;;  %s3524_s26 = smov 16  }
  0x51   :  { %134 = vperm.xlu0 %3260, %v127_v4   ;;  %2958 = vmatprep.subr.mxu0 %v146_v5  ;;  %v235_v29 = vld [vmem:[#allocation2] sm:$0xff]  ;;  %s3525_s27 = smov 32   ;;  %s3526_s29 = smov 48   ;;  %v347_v63 = vadd.s32 8, %v3695_v33  ;;  %v362_v2 = vand.u32 4294967288, %v3667_v12  ;;  %vm668_vm15 = vcmask 523264  }
  0x52   :  { %2959 = vmatpush3.msra.mxu0 %v146_v5  ;;  %2979 = vmatpush3.msra.mxu1 %v398_v21  ;;  %v3700_v35 = vld [vmem:[#allocation10] sm:$0xff]  ;;  %v349_v5 = vadd.s32 24, %v3695_v33  ;;  %s3529_s17 = smov 24  }
  0x53   :  { %2960 = vmatprep.subr.mxu0 %v145_v6  ;;  %2980 = vmatprep.subr.mxu1 %v397_v22  ;;  %v402_v36 = vrot.slane %v3700_v35, %v3698_v34  ;;  %v329_v47 = vld [vmem:[%s4374_s2] sm:$0x1]  ;;  %v355_v4 = vand.u32 4294967288, %v347_v63  ;;  %s3528_s2 = smov 64  }
  0x54   :  { %2961 = vmatpush3.msra.mxu0 %v145_v6  ;;  %2981 = vmatpush3.msra.mxu1 %v397_v22  ;;  %v333_v48 = vrot.slane %v329_v47, %v3698_v34 }
  0x55   :  { %2962 = vmatprep.subr.mxu0 %v144_v7  ;;  %2982 = vmatprep.subr.mxu1 %v396_v23  ;;  %vm364_vm10 = vcmp.eq.s32.totalorder %v355_v4, %v362_v2 }
  0x56   :  { %2963 = vmatpush3.msra.mxu0 %v144_v7  ;;  %2983 = vmatpush3.msra.mxu1 %v396_v23  ;;  %v354_v7 = vand.u32 4294967288, %v3695_v33 }
  0x57   :  { %2964 = vmatprep.subr.mxu0 %v143_v8  ;;  %2984 = vmatprep.subr.mxu1 %v395_v24 }
  0x58   :  { %2965 = vmatpush3.msra.mxu0 %v143_v8  ;;  %2985 = vmatpush3.msra.mxu1 %v395_v24  ;;  %v348_v8 = vadd.s32 16, %v3695_v33  ;;  %vm3801_vm12 = vcmp.eq.s32.totalorder %v354_v7, %v362_v2  ;;  %v352_v24 = vadd.s32 48, %v3695_v33 }
  0x59   :  { %2966 = vmatprep.subr.mxu0 %v142_v9 }
  0x5a   :  { %2967 = vmatpush3.msra.mxu0 %v142_v9  ;;  %v357_v9 = vand.u32 4294967288, %v349_v5  ;;  %v356_v11 = vand.u32 4294967288, %v348_v8 }
  0x5b   :  { %2971 = vmatprep.subr.mxu0 %v237_v10 }
  0x5c   :  { %vm3808_vm13 = vcmp.eq.s32.totalorder %v357_v9, %v362_v2  ;;  %vm3817_vm0 = vcmp.eq.s32.totalorder %v356_v11, %v362_v2 }
  0xc8   :  { %v132_v13 = vpop.permute.xlu0 %131 }
  0xc9   :  { %vm136_vm2 = vcmp.eq.s32.totalorder %v132_v13, %v3667_v12 }
  0xca   :  { %v2691_v15 = vsel %vm136_vm2, 1.0, %v3519_v14 }
  0xcb   :  { %2968 = vmatprep.mubr.msk.f32.mxu0 %vm149_vm1, %v2691_v15  ;;  %v3527_v15 = vmov -1e+09  }
  0xcc   :  { %v135_v16 = vpop.permute.xlu0 %134 }
  0xcd   :  { %vm137_vm3 = vcmp.eq.s32.totalorder %v135_v16, %v3667_v12  ;;  %v350_v12 = vadd.s32 32, %v3695_v33 }
  0xce   :  { %v2692_v17 = vsel %vm137_vm3, 1.0, %v3519_v14 }
  0xcf   :  { %2969 = vmatmul.mubr.msk.f32.vlgmr.msra.gmra.mxu0 %vm149_vm1, %v2692_v17  ;;  %v358_v23 = vand.u32 4294967288, %v350_v12 }
  0xd0   :  { %2972 = vmatpush3.msra.mxu0 %v237_v10  ;;  %v351_v10 = vadd.s32 40, %v3695_v33 }
  0xd1   :  { %2973 = vmatprep.subr.mxu0 %v236_v18 }
  0xd2   :  { %2974 = vmatpush3.msra.mxu0 %v236_v18  ;;  %v359_v18 = vand.u32 4294967288, %v351_v10 }
  0xd4   :  { %vm3831_vm2 = vcmp.eq.s32.totalorder %v359_v18, %v362_v2 }
 0x18f   :  { %v2970_v19 = vpop.f32.mrf.mxu0 }
 0x191   :  { %v226_v20 = vpop.f32.mrf.mxu0 }
 0x192   :  { %2975 = vmatprep.mubr.msk.f32.mxu0 %vm245_vm4, %v226_v20 }
 0x193   :  { %2976 = vmatmul.mubr.msk.f32.vlgmr.msra.gmra.mxu0 %vm245_vm4, %v2970_v19  ;;  %v353_v19 = vadd.s32 56, %v3695_v33 }
 0x253   :  { %v2977_v26 = vpop.f32.mrf.mxu0 }
 0x254   :  { %v324_v27 = vadd.f32 %v2977_v26, %v2696_v25 }
 0x255   :  { %v318_v28 = vpop.f32.mrf.mxu0 }
 0x256   :  { %v319_v30 = vadd.f32 %v2696_v25, %v318_v28  ;;  %v3689_v32 = vadd.f32 %v324_v27, %v235_v29 }
 0x258   :  { %v3687_v31 = vadd.f32 %v319_v30, %v235_v29  ;;  %v361_v30 = vand.u32 4294967288, %v353_v19 }
 0x25a   :  { %2986 = vmatprep.mubr.msk.f32.mxu1 %vm341_vm5, %v3687_v31 }
 0x25b   :  { %2987 = vmatmul.mubr.msk.f32.vlgmr.msra.gmra.mxu1 %vm341_vm5, %v3689_v32 }
 0x31b   :  { %v2988_v37 = vpop.f32.mrf.mxu1 }
 0x31c   :  { %v3704_v38 = vadd.f32 %v2988_v37, %v402_v36 }
 0x31d   :  { %v475_v39 = vpop.f32.mrf.mxu1 }
 0x31e   :  { %v3706_v40 = vadd.f32 %v475_v39, %v402_v36  ;;  %492 = vrot.lane.b32.xlu0 %v3704_v38, %s3520_s13  ;;  %496 = vrot.lane.b32.xlu1 %v3704_v38, %s3521_s20 }
 0x320   :  { %3005 = vmatprep.mubr.msk.f32.mxu1 %vm514_vm6, %v3706_v40 }
 0x322   :  { %488 = vrot.lane.b32.xlu0 %v3704_v38, %s3522_s23  ;;  %494 = vrot.lane.b32.xlu1 %v3706_v40, %s3521_s20 }
 0x326   :  { %490 = vrot.lane.b32.xlu1 %v3706_v40, %s3520_s13 }
 0x32a   :  { %486 = vrot.lane.b32.xlu1 %v3706_v40, %s3522_s23 }
 0x390   :  { %v3722_v41 = vpop.permute.xlu1 %496  ;;  %v3726_v42 = vpop.permute.xlu0 %492 }
 0x391   :  { %512 = vrot.lane.b32.xlu0 %v3722_v41, %s3523_s24 }
 0x394   :  { %v3728_v43 = vpop.permute.xlu1 %494  ;;  %v3734_v44 = vpop.permute.xlu0 %488 }
 0x395   :  { %508 = vrot.lane.b32.xlu0 %v3726_v42, %s3523_s24  ;;  %510 = vrot.lane.b32.xlu1 %v3728_v43, %s3523_s24 }
 0x398   :  { %v3736_v45 = vpop.permute.xlu1 %490 }
 0x399   :  { %504 = vrot.lane.b32.xlu0 %v3734_v44, %s3523_s24  ;;  %506 = vrot.lane.b32.xlu1 %v3736_v45, %s3523_s24 }
 0x39c   :  { %v3742_v46 = vpop.permute.xlu1 %486 }
 0x39d   :  { %500 = vrot.lane.b32.xlu0 %v3704_v38, %s3523_s24  ;;  %502 = vrot.lane.b32.xlu1 %v3742_v46, %s3523_s24 }
 0x3a1   :  { %498 = vrot.lane.b32.xlu1 %v3706_v40, %s3523_s24  ;;  %334 = vrot.lane.b32.xlu0 %v333_v48, %s3524_s26 }
 0x3a5   :  { %336 = vrot.lane.b32.xlu1 %v333_v48, %s3525_s27  ;;  %338 = vrot.lane.b32.xlu0 %v333_v48, %s3526_s29 }
 0x403   :  { %v513_v49 = vpop.permute.xlu0 %512 }
 0x404   :  { %2989 = vmatprep.subr.msk.mxu1 %vm514_vm6, %v513_v49 }
 0x405   :  { %2990 = vmatpush3.xpose.msk.msra.mxu1 %vm514_vm6, %v513_v49 }
 0x407   :  { %v511_v50 = vpop.permute.xlu1 %510  ;;  %v509_v51 = vpop.permute.xlu0 %508 }
 0x408   :  { %2991 = vmatprep.subr.msk.mxu1 %vm514_vm6, %v511_v50 }
 0x409   :  { %2992 = vmatpush3.xpose.msk.msra.mxu1 %vm514_vm6, %v511_v50  ;;  %v360_v50 = vand.u32 4294967288, %v352_v24 }
 0x40a   :  { %2993 = vmatprep.subr.msk.mxu1 %vm514_vm6, %v509_v51 }
 0x40b   :  { %v507_v52 = vpop.permute.xlu1 %506  ;;  %v505_v53 = vpop.permute.xlu0 %504 }
 0x40d   :  { %2994 = vmatpush3.xpose.msk.msra.mxu1 %vm514_vm6, %v509_v51 }
 0x40e   :  { %2995 = vmatprep.subr.msk.mxu1 %vm514_vm6, %v507_v52 }
 0x40f   :  { %v503_v54 = vpop.permute.xlu1 %502  ;;  %v501_v55 = vpop.permute.xlu0 %500 }
 0x411   :  { %2996 = vmatpush3.xpose.msk.msra.mxu1 %vm514_vm6, %v507_v52 }
 0x412   :  { %2997 = vmatprep.subr.msk.mxu1 %vm514_vm6, %v505_v53 }
 0x413   :  { %v499_v56 = vpop.permute.xlu1 %498  ;;  %v335_v57 = vpop.permute.xlu0 %334 }
 0x414   :  { %v340_v58 = vsel %vm245_vm4, %v329_v47, %v335_v57 }
 0x415   :  { %2998 = vmatpush3.xpose.msk.msra.mxu1 %vm514_vm6, %v505_v53 }
 0x416   :  { %2999 = vmatprep.subr.msk.mxu1 %vm514_vm6, %v503_v54 }
 0x417   :  { %v337_v59 = vpop.permute.xlu1 %336  ;;  %v339_v61 = vpop.permute.xlu0 %338 }
 0x418   :  { %v342_v60 = vsel %vm341_vm5, %v340_v58, %v337_v59 }
 0x419   :  { %3000 = vmatpush3.xpose.msk.msra.mxu1 %vm514_vm6, %v503_v54  ;;  %v344_v62 = vsel %vm343_vm7, %v342_v60, %v339_v61  ;;  %vm3844_vm7 = vcmp.eq.s32.totalorder %v358_v23, %v362_v2 }
 0x41a   :  { %3001 = vmatprep.subr.msk.mxu1 %vm514_vm6, %v501_v55  ;;  %vm371_vm8 = vcmp.eq.s32.totalorder %v344_v62, 0 }
 0x41b   :  { %v372_v1 = vsel %vm371_vm8, 1, %v3518_v0 }
 0x41c   :  { %v376_v3 = vrot.slane %v372_v1, %v3698_v34 }
 0x41d   :  { %3002 = vmatpush3.xpose.msk.msra.mxu1 %vm514_vm6, %v501_v55 }
 0x41e   :  { %3003 = vmatprep.subr.msk.mxu1 %vm514_vm6, %v499_v56  ;;  %vm3792_vm9 = vcmp.eq.s32.totalorder %v376_v3, 1 }
 0x41f   :  { %vm379_vm11 = vmand %vm364_vm10, %vm3792_vm9  ;;  %vm3856_vm10 = vcmp.eq.s32.totalorder %v361_v30, %v362_v2 }
 0x420   :  { %v3806_v16 = vsel %vm379_vm11, 0.0, %v3527_v15  ;;  %vm378_vm14 = vmand %vm3801_vm12, %vm3792_vm9  ;;  %vm3867_vm12 = vcmp.eq.s32.totalorder %v360_v50, %v362_v2 }
 0x421   :  { %3004 = vmatpush3.xpose.msk.msra.mxu1 %vm514_vm6, %v499_v56  ;;  %vm381_vm1 = vmand %vm3808_vm13, %vm3792_vm9  ;;  %v3829_v28 = vsel %vm378_vm14, 0.0, %v3527_v15 }
 0x422   :  { %vm380_vm3 = vmand %vm3817_vm0, %vm3792_vm9  ;;  %v3842_v48 = vsel %vm381_vm1, 0.0, %v3527_v15  ;;  %vm2201_vm0 = vcmask 1040384  }
 0x423   :  { %vm383_vm8 = vmand %vm3831_vm2, %vm3792_vm9  ;;  %v3854_v55 = vsel %vm380_vm3, 0.0, %v3527_v15  ;;  %vm2368_vm3 = vcmask 25600  }
 0x424   :  { %3006 = vmatmul.mubr.msk.f32.vlgmr.msra.gmra.mxu1 %vm514_vm6, %v3704_v38  ;;  %vm382_vm11 = vmand %vm3844_vm7, %vm3792_vm9  ;;  %v3865_v60 = vsel %vm383_vm8, 0.0, %v3527_v15 }
 0x425   :  { %3008 = vmatprep.mubr.msk.f32.mxu1 %vm514_vm6, %v3742_v46  ;;  %vm385_vm13 = vmand %vm3856_vm10, %vm3792_vm9  ;;  %v3878_v5 = vsel %vm382_vm11, 0.0, %v3527_v15 }
 0x426   :  { %vm384_vm14 = vmand %vm3867_vm12, %vm3792_vm9  ;;  %v3885_v9 = vsel %vm385_vm13, 0.0, %v3527_v15  ;;  %vm938_vm9 = vcmask 195584  }
 0x428   :  { %3009 = vmatmul.mubr.msk.f32.gmra.mxu1 %vm514_vm6, %v3734_v44 }
 0x429   :  { %3011 = vmatprep.mubr.msk.f32.mxu1 %vm514_vm6, %v3736_v45 }
 0x42c   :  { %3012 = vmatmul.mubr.msk.f32.gmra.mxu1 %vm514_vm6, %v3726_v42 }
 0x42d   :  { %3014 = vmatprep.mubr.msk.f32.mxu1 %vm514_vm6, %v3728_v43 }
 0x430   :  { %3015 = vmatmul.mubr.msk.f32.gmra.mxu1 %vm514_vm6, %v3722_v41 }
 0x4e4   :  { %v3007_v13 = vpop.f32.mrf.mxu1 }
 0x4e5   :  { %v653_v20 = vmul.f32 0.35355338, %v3007_v13  ;;  %v3890_v13 = vsel %vm384_vm14, 0.0, %v3527_v15 }
 0x4e6   :  { %v613_v21 = vpop.f32.mrf.mxu1 }
 0x4e7   :  { %v652_v25 = vmul.f32 0.35355338, %v613_v21  ;;  %v3823_v26 = vadd.f32 %v653_v20, %v3806_v16 }
 0x4e8   :  { %v3010_v27 = vpop.f32.mrf.mxu1 }
 0x4e9   :  { %v655_v36 = vmul.f32 0.35355338, %v3010_v27  ;;  %v672_v37 = vsel %vm668_vm15, %v3823_v26, -inf  ;;  %v660_v39 = vadd.f32 %v652_v25, %v3829_v28 }
 0x4ea   :  { %673 = vmax.xlane.f32.xlu0 %v672_v37  ;;  %v623_v47 = vpop.f32.mrf.mxu1 }
 0x4eb   :  { %v654_v51 = vmul.f32 0.35355338, %v623_v47  ;;  %v669_v52 = vsel %vm668_vm15, %v660_v39, -inf  ;;  %v663_v53 = vadd.f32 %v655_v36, %v3842_v48 }
 0x4ec   :  { %670 = vmax.xlane.f32.xlu1 %v669_v52  ;;  %v3013_v54 = vpop.f32.mrf.mxu1 }
 0x4ed   :  { %v657_v57 = vmul.f32 0.35355338, %v3013_v54  ;;  %v662_v58 = vadd.f32 %v654_v51, %v3854_v55  ;;  %v678_v63 = vsel %vm668_vm15, %v663_v53, -inf }
 0x4ee   :  { %v633_v59 = vpop.f32.mrf.mxu1 }
 0x4ef   :  { %v656_v62 = vmul.f32 0.35355338, %v633_v59  ;;  %v675_v1 = vsel %vm668_vm15, %v662_v58, -inf  ;;  %v665_v3 = vadd.f32 %v657_v57, %v3865_v60 }
 0x4f0   :  { %679 = vmax.xlane.f32.xlu1 %v678_v63  ;;  %676 = vmax.xlane.f32.xlu0 %v675_v1  ;;  %v3016_v4 = vpop.f32.mrf.mxu1 }
 0x4f1   :  { %v659_v2 = vmul.f32 0.35355338, %v3016_v4  ;;  %v664_v7 = vadd.f32 %v656_v62, %v3878_v5  ;;  %v684_v0 = vsel %vm668_vm15, %v665_v3, -inf }
 0x4f2   :  { %v643_v8 = vpop.f32.mrf.mxu1 }
 0x4f3   :  { %v658_v10 = vmul.f32 0.35355338, %v643_v8  ;;  %v681_v11 = vsel %vm668_vm15, %v664_v7, -inf  ;;  %v667_v12 = vadd.f32 %v659_v2, %v3885_v9 }
 0x4f4   :  { %685 = vmax.xlane.f32.xlu1 %v684_v0  ;;  %682 = vmax.xlane.f32.xlu0 %v681_v11 }
 0x4f5   :  { %v666_v17 = vadd.f32 %v658_v10, %v3890_v13  ;;  %v690_v6 = vsel %vm668_vm15, %v667_v12, -inf }
 0x4f7   :  { %v687_v18 = vsel %vm668_vm15, %v666_v17, -inf }
 0x4f8   :  { %691 = vmax.xlane.f32.xlu1 %v690_v6  ;;  %688 = vmax.xlane.f32.xlu0 %v687_v18 }
 0x509   :  { %769 = vrot.lane.b32.xlu1 %v3728_v43, %s3528_s2 }
 0x50d   :  { %767 = vrot.lane.b32.xlu1 %v3726_v42, %s3528_s2 }
 0x50e   :  { %771 = vrot.lane.b32.xlu0 %v3722_v41, %s3528_s2 }
 0x511   :  { %763 = vrot.lane.b32.xlu1 %v3734_v44, %s3528_s2 }
 0x512   :  { %765 = vrot.lane.b32.xlu0 %v3736_v45, %s3528_s2 }
 0x516   :  { %761 = vrot.lane.b32.xlu0 %v3742_v46, %s3528_s2 }
 0x573   :  { %v674_v15 = vpop.xlane.xlu0 %673 }
 0x574   :  { %v694_v19 = vsub.f32 %v3823_v26, %v674_v15 }
 0x575   :  { %v671_v20 = vpop.xlane.xlu1 %670 }
 0x576   :  { %v703_v43 = vmul.f32 1.442695, %v694_v19  ;;  %v693_v21 = vsub.f32 %v660_v39, %v671_v20 }
 0x578   :  { %3266 = vpow2.f32 %v703_v43  ;;  %v701_v42 = vmul.f32 1.442695, %v693_v21 }
 0x579   :  { %v680_v22 = vpop.xlane.xlu1 %679  ;;  %v677_v23 = vpop.xlane.xlu0 %676 }
 0x57a   :  { %3268 = vpow2.f32 %v701_v42  ;;  %v696_v41 = vsub.f32 %v663_v53, %v680_v22  ;;  %v695_v24 = vsub.f32 %v662_v58, %v677_v23 }
 0x57c   :  { %v707_v44 = vmul.f32 1.442695, %v696_v41  ;;  %v705_v25 = vmul.f32 1.442695, %v695_v24 }
 0x57d   :  { %v686_v27 = vpop.xlane.xlu1 %685  ;;  %v683_v45 = vpop.xlane.xlu0 %682 }
 0x57e   :  { %3270 = vpow2.f32 %v707_v44  ;;  %v698_v29 = vsub.f32 %v665_v3, %v686_v27  ;;  %v697_v46 = vsub.f32 %v664_v7, %v683_v45 }
 0x57f   :  { %3272 = vpow2.f32 %v705_v25 }
 0x580   :  { %v711_v30 = vmul.f32 1.442695, %v698_v29  ;;  %v709_v26 = vmul.f32 1.442695, %v697_v46 }
 0x581   :  { %v692_v36 = vpop.xlane.xlu1 %691  ;;  %v689_v37 = vpop.xlane.xlu0 %688 }
 0x582   :  { %3274 = vpow2.f32 %v711_v30  ;;  %v700_v39 = vsub.f32 %v667_v12, %v692_v36  ;;  %v699_v47 = vsub.f32 %v666_v17, %v689_v37 }
 0x583   :  { %3276 = vpow2.f32 %v709_v26 }
 0x584   :  { %v715_v49 = vmul.f32 1.442695, %v700_v39  ;;  %v713_v50 = vmul.f32 1.442695, %v699_v47 }
 0x585   :  { %v3908_v51 = vpop.eup %3266  ;;  %v770_v52 = vpop.permute.xlu1 %769 }
 0x586   :  { %v772_v53 = vpop.permute.xlu0 %771  ;;  %3278 = vpow2.f32 %v715_v49  ;;  %v720_v54 = vsel %vm668_vm15, %v3908_v51, 0.0  ;;  %v944_v49 = vld [vmem:[%s4380_s8 + $0x18] sm:$0xff] }
 0x587   :  { %3017 = vmatprep.subr.mxu0 %v772_v53  ;;  %v3269_v56 = vpop.eup %3268  ;;  %3280 = vpow2.f32 %v713_v50  ;;  %721 = vadd.xlane.f32.xlu1 %v720_v54  ;;  %v943_v50 = vld [vmem:[%s4380_s8 + $0x10] sm:$0xff] }
 0x588   :  { %3018 = vmatpush3.msra.mxu0 %v772_v53  ;;  %v717_v57 = vsel %vm668_vm15, %v3269_v56, 0.0 }
 0x589   :  { %3019 = vmatprep.subr.mxu0 %v770_v52  ;;  %v768_v58 = vpop.permute.xlu1 %767  ;;  %718 = vadd.xlane.f32.xlu0 %v717_v57 }
 0x58a   :  { %3020 = vmatpush3.msra.mxu0 %v770_v52  ;;  %v766_v59 = vpop.permute.xlu0 %765  ;;  %v941_v52 = vld [vmem:[%s4380_s8] sm:$0xff] }
 0x58b   :  { %3021 = vmatprep.subr.mxu0 %v768_v58  ;;  %v3271_v61 = vpop.eup %3270 }
 0x58c   :  { %3022 = vmatpush3.msra.mxu0 %v768_v58  ;;  %v3273_v62 = vpop.eup %3272  ;;  %v726_v63 = vsel %vm668_vm15, %v3271_v61, 0.0 }
 0x58d   :  { %3023 = vmatprep.subr.mxu0 %v766_v59  ;;  %727 = vadd.xlane.f32.xlu1 %v726_v63  ;;  %v764_v1 = vpop.permute.xlu1 %763  ;;  %v723_v3 = vsel %vm668_vm15, %v3273_v62, 0.0 }
 0x58e   :  { %3024 = vmatpush3.msra.mxu0 %v766_v59  ;;  %724 = vadd.xlane.f32.xlu0 %v723_v3  ;;  %v762_v2 = vpop.permute.xlu0 %761 }
 0x58f   :  { %3025 = vmatprep.subr.mxu0 %v764_v1  ;;  %v3275_v4 = vpop.eup %3274 }
 0x590   :  { %3026 = vmatpush3.msra.mxu0 %v764_v1  ;;  %v3277_v7 = vpop.eup %3276  ;;  %v732_v8 = vsel %vm668_vm15, %v3275_v4, 0.0 }
 0x591   :  { %3027 = vmatprep.subr.mxu0 %v762_v2  ;;  %733 = vadd.xlane.f32.xlu1 %v732_v8  ;;  %v729_v10 = vsel %vm668_vm15, %v3277_v7, 0.0 }
 0x592   :  { %3028 = vmatpush3.msra.mxu0 %v762_v2  ;;  %730 = vadd.xlane.f32.xlu0 %v729_v10 }
 0x593   :  { %v3279_v0 = vpop.eup %3278 }
 0x594   :  { %v3281_v11 = vpop.eup %3280  ;;  %v738_v12 = vsel %vm668_vm15, %v3279_v0, 0.0 }
 0x595   :  { %739 = vadd.xlane.f32.xlu1 %v738_v12  ;;  %v735_v17 = vsel %vm668_vm15, %v3281_v11, 0.0 }
 0x596   :  { %736 = vadd.xlane.f32.xlu0 %v735_v17 }
 0x5a6   :  { %759 = vrot.lane.b32.xlu1 %v3704_v38, %s3528_s2 }
 0x5ac   :  { %757 = vrot.lane.b32.xlu0 %v3706_v40, %s3528_s2 }
 0x610   :  { %v722_v6 = vpop.xlane.xlu1 %721 }
 0x612   :  { %v719_v18 = vpop.xlane.xlu0 %718 }
 0x613   :  { %3282 = vrcp.f32 %v719_v18 }
 0x614   :  { %3284 = vrcp.f32 %v722_v6  ;;  %v3959_v6 = vsub.s32 1, %v3695_v33 }
 0x616   :  { %v728_v15 = vpop.xlane.xlu1 %727  ;;  %v948_v18 = vrot.slane %v3700_v35, %v3959_v6 }
 0x617   :  { %v725_v19 = vpop.xlane.xlu0 %724 }
 0x618   :  { %3286 = vrcp.f32 %v725_v19 }
 0x619   :  { %3288 = vrcp.f32 %v728_v15 }
 0x61a   :  { %v734_v20 = vpop.xlane.xlu1 %733 }
 0x61b   :  { %v731_v43 = vpop.xlane.xlu0 %730 }
 0x61c   :  { %3290 = vrcp.f32 %v731_v43 }
 0x61d   :  { %3292 = vrcp.f32 %v734_v20 }
 0x61e   :  { %v740_v21 = vpop.xlane.xlu1 %739 }
 0x61f   :  { %v737_v42 = vpop.xlane.xlu0 %736 }
 0x620   :  { %v3283_v22 = vpop.eup %3282  ;;  %3294 = vrcp.f32 %v737_v42 }
 0x621   :  { %3296 = vrcp.f32 %v740_v21  ;;  %v742_v38 = vmul.f32 %v3283_v22, %v3269_v56  ;;  %v3285_v23 = vpop.eup %3284 }
 0x622   :  { %v760_v40 = vpop.permute.xlu1 %759  ;;  %v744_v44 = vmul.f32 %v3285_v23, %v3908_v51  ;;  %v942_v51 = vld [vmem:[%s4380_s8 + $0x8] sm:$0xff] }
 0x623   :  { %3029 = vmatprep.subr.mxu0 %v760_v40  ;;  %3033 = vmatprep.mubr.msk.f32.mxu0 %vm668_vm15, %v742_v38  ;;  %v758_v41 = vpop.permute.xlu0 %757 }
 0x624   :  { %3030 = vmatpush3.msra.mxu0 %v760_v40 }
 0x625   :  { %v3287_v24 = vpop.eup %3286  ;;  %3031 = vmatprep.subr.mxu0 %v758_v41 }
 0x626   :  { %v3289_v25 = vpop.eup %3288  ;;  %3032 = vmatpush3.msra.mxu0 %v758_v41  ;;  %v746_v27 = vmul.f32 %v3287_v24, %v3273_v62 }
 0x627   :  { %3034 = vmatmul.mubr.msk.f32.vlgmr.msra.gmra.mxu0 %vm668_vm15, %v744_v44  ;;  %v748_v29 = vmul.f32 %v3289_v25, %v3271_v61  ;;  %3045 = vmatprep.subr.mxu0 %v944_v49 }
 0x628   :  { %3036 = vmatprep.mubr.msk.f32.mxu0 %vm668_vm15, %v746_v27  ;;  %3046 = vmatpush3.msra.mxu0 %v944_v49  ;;  %v1165_v49 = vld [vmem:[%s4382_s10 + $0x18] sm:$0xff] }
 0x629   :  { %v3291_v45 = vpop.eup %3290  ;;  %3047 = vmatprep.subr.mxu0 %v943_v50 }
 0x62a   :  { %v3293_v46 = vpop.eup %3292  ;;  %v750_v30 = vmul.f32 %v3291_v45, %v3277_v7  ;;  %3048 = vmatpush3.msra.mxu0 %v943_v50 }
 0x62b   :  { %3037 = vmatmul.mubr.msk.f32.gmra.mxu0 %vm668_vm15, %v748_v29  ;;  %v752_v36 = vmul.f32 %v3293_v46, %v3275_v4  ;;  %3049 = vmatprep.subr.mxu0 %v942_v51  ;;  %v1074_v46 = vld [vmem:[#allocation8 + $0x18] sm:$0xff] }
 0x62c   :  { %3039 = vmatprep.mubr.msk.f32.mxu0 %vm668_vm15, %v750_v30  ;;  %3050 = vmatpush3.msra.mxu0 %v942_v51  ;;  %v1072_v30 = vld [vmem:[#allocation8 + $0x8] sm:$0xff] }
 0x62d   :  { %v3295_v26 = vpop.eup %3294  ;;  %3051 = vmatprep.subr.mxu0 %v941_v52 }
 0x62e   :  { %v3297_v37 = vpop.eup %3296  ;;  %v754_v39 = vmul.f32 %v3295_v26, %v3281_v11  ;;  %3052 = vmatpush3.msra.mxu0 %v941_v52  ;;  %v1071_v26 = vld [vmem:[#allocation8] sm:$0xff] }
 0x62f   :  { %3040 = vmatmul.mubr.msk.f32.gmra.mxu0 %vm668_vm15, %v752_v36  ;;  %v756_v47 = vmul.f32 %v3297_v37, %v3279_v0  ;;  %3056 = vmatprep.subr.mxu0 %v1074_v46  ;;  %v1169_v36 = vld [vmem:[%s4382_s10 + $0x38] sm:$0xff]  ;;  %v1168_v37 = vld [vmem:[%s4382_s10 + $0x30] sm:$0xff] }
 0x630   :  { %3042 = vmatprep.mubr.msk.f32.mxu0 %vm668_vm15, %v754_v39  ;;  %3067 = vmatprep.subr.mxu1 %v1169_v36  ;;  %v1167_v39 = vld [vmem:[%s4382_s10 + $0x28] sm:$0xff] }
 0x631   :  { %3068 = vmatpush3.msra.mxu1 %v1169_v36 }
 0x632   :  { %3069 = vmatprep.subr.mxu1 %v1168_v37 }
 0x633   :  { %3043 = vmatmul.mubr.msk.f32.gmra.mxu0 %vm668_vm15, %v756_v47  ;;  %3070 = vmatpush3.msra.mxu1 %v1168_v37  ;;  %v1166_v47 = vld [vmem:[%s4382_s10 + $0x20] sm:$0xff] }
 0x634   :  { %3071 = vmatprep.subr.mxu1 %v1167_v39 }
 0x635   :  { %3072 = vmatpush3.msra.mxu1 %v1167_v39 }
 0x636   :  { %3073 = vmatprep.subr.mxu1 %v1166_v47 }
 0x637   :  { %3074 = vmatpush3.msra.mxu1 %v1166_v47  ;;  %v2734_v47 = vld [vmem:[%s4379_s7 + $0x38] sm:$0xff] }
 0x638   :  { %3075 = vmatprep.subr.mxu1 %v1165_v49 }
 0x639   :  { %3076 = vmatpush3.msra.mxu1 %v1165_v49  ;;  %v2733_v49 = vld [vmem:[%s4379_s7 + $0x30] sm:$0xff] }
 0x6e7   :  { %v3035_v53 = vpop.f32.mrf.mxu0 }
 0x6e9   :  { %v871_v54 = vpop.f32.mrf.mxu0 }
 0x6eb   :  { %v3038_v56 = vpop.f32.mrf.mxu0 }
 0x6ec   :  { %914 = vrot.lane.b32.xlu0 %v3038_v56, %s3512_s22 }
 0x6ed   :  { %v881_v57 = vpop.f32.mrf.mxu0 }
 0x6ee   :  { %912 = vrot.lane.b32.xlu1 %v881_v57, %s3512_s22  ;;  %v3985_v57 = vsub.s32 4, %v3695_v33 }
 0x6ef   :  { %v3041_v58 = vpop.f32.mrf.mxu0 }
 0x6f0   :  { %922 = vrot.lane.b32.xlu0 %v3041_v58, %s3524_s26 }
 0x6f1   :  { %v891_v59 = vpop.f32.mrf.mxu0 }
 0x6f2   :  { %920 = vrot.lane.b32.xlu1 %v891_v59, %s3524_s26  ;;  %v1062_v59 = vrot.slane %v3700_v35, %v3985_v57 }
 0x6f3   :  { %v3044_v61 = vpop.f32.mrf.mxu0 }
 0x6f4   :  { %930 = vrot.lane.b32.xlu0 %v3044_v61, %s3529_s17  ;;  %v3990_v61 = vsub.s32 5, %v3695_v33 }
 0x6f5   :  { %v901_v62 = vpop.f32.mrf.mxu0 }
 0x6f6   :  { %928 = vrot.lane.b32.xlu1 %v901_v62, %s3529_s17 }
 0x75e   :  { %v915_v63 = vpop.permute.xlu0 %914 }
 0x75f   :  { %v935_v8 = vsel %vm514_vm6, %v3035_v53, %v915_v63 }
 0x760   :  { %v913_v1 = vpop.permute.xlu1 %912 }
 0x761   :  { %v934_v2 = vsel %vm514_vm6, %v871_v54, %v913_v1 }
 0x762   :  { %v923_v3 = vpop.permute.xlu0 %922 }
 0x763   :  { %v937_v11 = vsel %vm245_vm4, %v935_v8, %v923_v3 }
 0x764   :  { %v921_v4 = vpop.permute.xlu1 %920 }
 0x765   :  { %v936_v10 = vsel %vm245_vm4, %v934_v2, %v921_v4  ;;  %v1068_v4 = vrot.slane %v3700_v35, %v3990_v61 }
 0x766   :  { %v931_v7 = vpop.permute.xlu0 %930 }
 0x767   :  { %v940_v17 = vsel %vm938_vm9, %v937_v11, %v931_v7  ;;  %v1162_v11 = vld [vmem:[%s4382_s10] sm:$0xff] }
 0x768   :  { %v929_v0 = vpop.permute.xlu1 %928 }
 0x769   :  { %v939_v12 = vsel %vm938_vm9, %v936_v10, %v929_v0  ;;  %v1164_v10 = vld [vmem:[%s4382_s10 + $0x10] sm:$0xff]  ;;  %v1163_v0 = vld [vmem:[%s4382_s10 + $0x8] sm:$0xff] }
 0x76a   :  { %3053 = vmatprep.mubr.msk.f32.mxu0 %vm341_vm5, %v939_v12  ;;  %3077 = vmatprep.subr.mxu1 %v1164_v10  ;;  %v4006_v12 = vsub.s32 2, %v3695_v33 }
 0x76b   :  { %3054 = vmatmul.mubr.msk.f32.vlgmr.msra.gmra.mxu0 %vm341_vm5, %v940_v17  ;;  %3078 = vmatpush3.msra.mxu1 %v1164_v10 }
 0x76c   :  { %3057 = vmatpush3.msra.mxu0 %v1074_v46  ;;  %3079 = vmatprep.subr.mxu1 %v1163_v0  ;;  %v1078_v17 = vrot.slane %v3700_v35, %v4006_v12 }
 0x76d   :  { %3080 = vmatpush3.msra.mxu1 %v1163_v0 }
 0x76e   :  { %3081 = vmatprep.subr.mxu1 %v1162_v11 }
 0x76f   :  { %3082 = vmatpush3.msra.mxu1 %v1162_v11 }
 0x82b   :  { %v3055_v15 = vpop.f32.mrf.mxu0 }
 0x82c   :  { %v1027_v19 = vadd.f32 %v3055_v15, %v948_v18 }
 0x82d   :  { %v1021_v20 = vpop.f32.mrf.mxu0 }
 0x82e   :  { %v1022_v43 = vadd.f32 %v1021_v20, %v948_v18  ;;  %v1031_v21 = vadd.f32 %v1027_v19, %v3689_v32 }
 0x830   :  { %v1035_v42 = vsel %vm341_vm5, %v1031_v21, 0.0  ;;  %v1030_v22 = vadd.f32 %v1022_v43, %v3687_v31  ;;  %v1073_v31 = vld [vmem:[#allocation8 + $0x10] sm:$0xff] }
 0x831   :  { %1036 = vadd.xlane.f32.xlu0 %v1035_v42  ;;  %3058 = vmatprep.subr.mxu0 %v1073_v31  ;;  %v4013_v42 = vsub.s32 3, %v3695_v33 }
 0x832   :  { %v1032_v38 = vsel %vm341_vm5, %v1030_v22, 0.0  ;;  %3059 = vmatpush3.msra.mxu0 %v1073_v31 }
 0x833   :  { %1033 = vadd.xlane.f32.xlu1 %v1032_v38  ;;  %3060 = vmatprep.subr.mxu0 %v1072_v30 }
 0x834   :  { %3061 = vmatpush3.msra.mxu0 %v1072_v30 }
 0x835   :  { %3062 = vmatprep.subr.mxu0 %v1071_v26 }
 0x836   :  { %3063 = vmatpush3.msra.mxu0 %v1071_v26 }
 0x837   :  { %3086 = vmatprep.subr.mxu0 %v2734_v47 }
 0x8ba   :  { %v1037_v23 = vpop.xlane.xlu0 %1036 }
 0x8bb   :  { %v1040_v40 = vmul.f32 0.03125, %v1037_v23 }
 0x8bc   :  { %v1034_v41 = vpop.xlane.xlu1 %1033 }
 0x8bd   :  { %v1042_v24 = vsub.f32 %v1031_v21, %v1040_v40  ;;  %v1039_v44 = vmul.f32 0.03125, %v1034_v41 }
 0x8bf   :  { %v1041_v25 = vsub.f32 %v1030_v22, %v1039_v44  ;;  %v1044_v27 = vmul.f32 %v1042_v24, %v1042_v24  ;;  %v1173_v22 = vrot.slane %v3700_v35, %v4013_v42 }
 0x8c1   :  { %v1048_v45 = vsel %vm341_vm5, %v1044_v27, 0.0  ;;  %v1043_v29 = vmul.f32 %v1041_v25, %v1041_v25 }
 0x8c2   :  { %1049 = vadd.xlane.f32.xlu1 %v1048_v45 }
 0x8c3   :  { %v1045_v32 = vsel %vm341_vm5, %v1043_v29, 0.0 }
 0x8c4   :  { %1046 = vadd.xlane.f32.xlu0 %v1045_v32 }
 0x94b   :  { %v1050_v50 = vpop.xlane.xlu1 %1049 }
 0x94c   :  { %v1052_v51 = vmul.f32 0.03125, %v1050_v50  ;;  %v2732_v50 = vld [vmem:[%s4379_s7 + $0x28] sm:$0xff] }
 0x94d   :  { %v1047_v52 = vpop.xlane.xlu0 %1046 }
 0x94e   :  { %v1054_v53 = vadd.f32 1e-05, %v1052_v51  ;;  %v1051_v54 = vmul.f32 0.03125, %v1047_v52  ;;  %v2731_v51 = vld [vmem:[%s4379_s7 + $0x20] sm:$0xff] }
 0x950   :  { %3298 = vrsqrt.f32 %v1054_v53  ;;  %v1053_v56 = vadd.f32 1e-05, %v1051_v54 }
 0x952   :  { %3300 = vrsqrt.f32 %v1053_v56 }
 0x95d   :  { %v3299_v58 = vpop.eup %3298 }
 0x95e   :  { %v1058_v62 = vmul.f32 %v3299_v58, %v1042_v24 }
 0x95f   :  { %v3301_v63 = vpop.eup %3300 }
 0x960   :  { %v1057_v1 = vmul.f32 %v3301_v63, %v1041_v25  ;;  %v1064_v3 = vmul.f32 %v1062_v59, %v1058_v62  ;;  %v1285_v62 = vsub.s32 6, %v3695_v33 }
 0x962   :  { %v1063_v2 = vmul.f32 %v1062_v59, %v1057_v1  ;;  %v1070_v8 = vadd.f32 %v1068_v4, %v1064_v3  ;;  %v1286_v1 = vrot.slane %v3700_v35, %v1285_v62  ;;  %v1291_v3 = vsub.s32 7, %v3695_v33  ;;  %v2789_v33 = vld [vmem:[%s4384_s12 + $0x50] sm:$0xff] }
 0x964   :  { %v1069_v7 = vadd.f32 %v1068_v4, %v1063_v2  ;;  %v1292_v10 = vrot.slane %v3700_v35, %v1291_v3 }
 0x966   :  { %3064 = vmatprep.mubr.msk.f32.mxu0 %vm341_vm5, %v1069_v7 }
 0x967   :  { %3065 = vmatmul.mubr.msk.f32.vlgmr.msra.gmra.mxu0 %vm341_vm5, %v1070_v8 }
 0x968   :  { %3087 = vmatpush3.msra.mxu0 %v2734_v47 }
 0x969   :  { %3088 = vmatprep.subr.mxu0 %v2733_v49 }
 0x96a   :  { %3089 = vmatpush3.msra.mxu0 %v2733_v49 }
 0x96b   :  { %3090 = vmatprep.subr.mxu0 %v2732_v50 }
 0x96c   :  { %3091 = vmatpush3.msra.mxu0 %v2732_v50 }
 0x96d   :  { %3092 = vmatprep.subr.mxu0 %v2731_v51 }
 0x96e   :  { %3093 = vmatpush3.msra.mxu0 %v2731_v51 }
 0xa27   :  { %v3066_v18 = vpop.f32.mrf.mxu0 }
 0xa28   :  { %v1157_v15 = vadd.f32 %v3066_v18, %v1078_v17  ;;  %v4049_v18 = vld [vmem:[#allocation10 + $0x8] sm:$0xff] }
 0xa29   :  { %v1151_v19 = vpop.f32.mrf.mxu0 }
 0xa2a   :  { %v1152_v20 = vadd.f32 %v1151_v19, %v1078_v17  ;;  %v1161_v21 = vmax.f32 %v1157_v15, 0.0  ;;  %v1305_v15 = vrot.slane %v4049_v18, %v3698_v34 }
 0xa2c   :  { %v1160_v43 = vmax.f32 %v1152_v20, 0.0 }
 0xa2e   :  { %3083 = vmatprep.mubr.msk.f32.mxu1 %vm668_vm15, %v1160_v43 }
 0xa2f   :  { %3084 = vmatmul.mubr.msk.f32.vlgmr.msra.gmra.mxu1 %vm668_vm15, %v1161_v21 }
 0xaef   :  { %v3085_v38 = vpop.f32.mrf.mxu1 }
 0xaf0   :  { %v1252_v23 = vadd.f32 %v3085_v38, %v1173_v22 }
 0xaf1   :  { %v1246_v40 = vpop.f32.mrf.mxu1 }
 0xaf2   :  { %v1247_v41 = vadd.f32 %v1246_v40, %v1173_v22  ;;  %v1256_v24 = vadd.f32 %v1252_v23, %v1070_v8 }
 0xaf4   :  { %v1260_v44 = vsel %vm341_vm5, %v1256_v24, 0.0  ;;  %v1255_v25 = vadd.f32 %v1247_v41, %v1069_v7 }
 0xaf5   :  { %1261 = vadd.xlane.f32.xlu1 %v1260_v44 }
 0xaf6   :  { %v1257_v27 = vsel %vm341_vm5, %v1255_v25, 0.0 }
 0xaf7   :  { %1258 = vadd.xlane.f32.xlu0 %v1257_v27 }
 0xb7e   :  { %v1262_v45 = vpop.xlane.xlu1 %1261 }
 0xb7f   :  { %v1264_v29 = vmul.f32 0.03125, %v1262_v45 }
 0xb80   :  { %v1259_v32 = vpop.xlane.xlu0 %1258 }
 0xb81   :  { %v1266_v46 = vsub.f32 %v1256_v24, %v1264_v29  ;;  %v1263_v31 = vmul.f32 0.03125, %v1259_v32 }
 0xb83   :  { %v1265_v30 = vsub.f32 %v1255_v25, %v1263_v31  ;;  %v1268_v26 = vmul.f32 %v1266_v46, %v1266_v46 }
 0xb85   :  { %v1272_v36 = vsel %vm341_vm5, %v1268_v26, 0.0  ;;  %v1267_v37 = vmul.f32 %v1265_v30, %v1265_v30 }
 0xb86   :  { %1273 = vadd.xlane.f32.xlu1 %v1272_v36 }
 0xb87   :  { %v1269_v39 = vsel %vm341_vm5, %v1267_v37, 0.0 }
 0xb88   :  { %1270 = vadd.xlane.f32.xlu0 %v1269_v39 }
 0xc0f   :  { %v1274_v52 = vpop.xlane.xlu1 %1273 }
 0xc10   :  { %v1276_v53 = vmul.f32 0.03125, %v1274_v52 }
 0xc11   :  { %v1271_v54 = vpop.xlane.xlu0 %1270 }
 0xc12   :  { %v1278_v56 = vadd.f32 1e-05, %v1276_v53  ;;  %v1275_v58 = vmul.f32 0.03125, %v1271_v54 }
 0xc14   :  { %3302 = vrsqrt.f32 %v1278_v56  ;;  %v1277_v59 = vadd.f32 1e-05, %v1275_v58 }
 0xc16   :  { %3304 = vrsqrt.f32 %v1277_v59 }
 0xc21   :  { %v3303_v63 = vpop.eup %3302 }
 0xc22   :  { %v1282_v4 = vmul.f32 %v3303_v63, %v1266_v46 }
 0xc23   :  { %v3305_v2 = vpop.eup %3304 }
 0xc24   :  { %v1281_v7 = vmul.f32 %v3305_v2, %v1265_v30  ;;  %v1288_v8 = vmul.f32 %v1286_v1, %v1282_v4 }
 0xc26   :  { %v1287_v0 = vmul.f32 %v1286_v1, %v1281_v7  ;;  %v4043_v17 = vadd.f32 %v1292_v10, %v1288_v8 }
 0xc28   :  { %v4041_v11 = vadd.f32 %v1292_v10, %v1287_v0 }
 0xc2a   :  { %3094 = vmatprep.mubr.msk.f32.mxu0 %vm341_vm5, %v4041_v11 }
 0xc2b   :  { %3095 = vmatmul.mubr.msk.f32.vlgmr.msra.gmra.mxu0 %vm341_vm5, %v4043_v17 }
 0xceb   :  { %v3096_v19 = vpop.f32.mrf.mxu0 }
 0xcec   :  { %v4053_v20 = vadd.f32 %v3096_v19, %v1305_v15 }
 0xced   :  { %v1378_v35 = vpop.f32.mrf.mxu0 }
 0xcee   :  { %v4055_v43 = vadd.f32 %v1378_v35, %v1305_v15  ;;  %1399 = vrot.lane.b32.xlu0 %v4053_v20, %s3521_s20 }
 0xcf0   :  { %1397 = vrot.lane.b32.xlu1 %v4055_v43, %s3521_s20  ;;  %3113 = vmatprep.mubr.msk.f32.mxu1 %vm514_vm6, %v4055_v43 }
 0xcf2   :  { %1393 = vrot.lane.b32.xlu0 %v4055_v43, %s3520_s13 }
 0xcf4   :  { %1395 = vrot.lane.b32.xlu1 %v4053_v20, %s3520_s13 }
 0xcf6   :  { %1389 = vrot.lane.b32.xlu0 %v4055_v43, %s3522_s23 }
 0xcf8   :  { %1391 = vrot.lane.b32.xlu1 %v4053_v20, %s3522_s23 }
 0xd60   :  { %v4071_v21 = vpop.permute.xlu0 %1399 }
 0xd61   :  { %1415 = vrot.lane.b32.xlu1 %v4071_v21, %s3523_s24 }
 0xd62   :  { %v4075_v22 = vpop.permute.xlu1 %1397 }
 0xd63   :  { %1413 = vrot.lane.b32.xlu0 %v4075_v22, %s3523_s24 }
 0xd64   :  { %v4079_v38 = vpop.permute.xlu0 %1393 }
 0xd66   :  { %v4081_v23 = vpop.permute.xlu1 %1395 }
 0xd67   :  { %1409 = vrot.lane.b32.xlu0 %v4079_v38, %s3523_s24  ;;  %1411 = vrot.lane.b32.xlu1 %v4081_v23, %s3523_s24 }
 0xd68   :  { %v4087_v40 = vpop.permute.xlu0 %1389 }
 0xd6a   :  { %v4089_v41 = vpop.permute.xlu1 %1391 }
 0xd6b   :  { %1405 = vrot.lane.b32.xlu0 %v4087_v40, %s3523_s24  ;;  %1407 = vrot.lane.b32.xlu1 %v4089_v41, %s3523_s24 }
 0xd6f   :  { %1401 = vrot.lane.b32.xlu0 %v4055_v43, %s3523_s24  ;;  %1403 = vrot.lane.b32.xlu1 %v4053_v20, %s3523_s24 }
 0xdd3   :  { %v1416_v24 = vpop.permute.xlu1 %1415 }
 0xdd4   :  { %3097 = vmatprep.subr.msk.mxu1 %vm514_vm6, %v1416_v24 }
 0xdd5   :  { %v1414_v44 = vpop.permute.xlu0 %1413  ;;  %3098 = vmatpush3.xpose.msk.msra.mxu1 %vm514_vm6, %v1416_v24 }
 0xdd6   :  { %3099 = vmatprep.subr.msk.mxu1 %vm514_vm6, %v1414_v44 }
 0xdd9   :  { %3100 = vmatpush3.xpose.msk.msra.mxu1 %vm514_vm6, %v1414_v44  ;;  %v1412_v25 = vpop.permute.xlu1 %1411  ;;  %v1410_v27 = vpop.permute.xlu0 %1409 }
 0xdda   :  { %3101 = vmatprep.subr.msk.mxu1 %vm514_vm6, %v1412_v25 }
 0xddd   :  { %3102 = vmatpush3.xpose.msk.msra.mxu1 %vm514_vm6, %v1412_v25  ;;  %v1408_v45 = vpop.permute.xlu1 %1407  ;;  %v1406_v29 = vpop.permute.xlu0 %1405 }
 0xdde   :  { %3103 = vmatprep.subr.msk.mxu1 %vm514_vm6, %v1410_v27 }
 0xde1   :  { %3104 = vmatpush3.xpose.msk.msra.mxu1 %vm514_vm6, %v1410_v27  ;;  %v1404_v32 = vpop.permute.xlu1 %1403  ;;  %v1402_v46 = vpop.permute.xlu0 %1401 }
 0xde2   :  { %3105 = vmatprep.subr.msk.mxu1 %vm514_vm6, %v1408_v45 }
 0xde5   :  { %3106 = vmatpush3.xpose.msk.msra.mxu1 %vm514_vm6, %v1408_v45 }
 0xde6   :  { %3107 = vmatprep.subr.msk.mxu1 %vm514_vm6, %v1406_v29 }
 0xde9   :  { %3108 = vmatpush3.xpose.msk.msra.mxu1 %vm514_vm6, %v1406_v29 }
 0xdea   :  { %3109 = vmatprep.subr.msk.mxu1 %vm514_vm6, %v1404_v32 }
 0xded   :  { %3110 = vmatpush3.xpose.msk.msra.mxu1 %vm514_vm6, %v1404_v32 }
 0xdee   :  { %3111 = vmatprep.subr.msk.mxu1 %vm514_vm6, %v1402_v46 }
 0xdf1   :  { %3112 = vmatpush3.xpose.msk.msra.mxu1 %vm514_vm6, %v1402_v46 }
 0xdf4   :  { %3114 = vmatmul.mubr.msk.f32.vlgmr.msra.gmra.mxu1 %vm514_vm6, %v4053_v20 }
 0xdf5   :  { %3116 = vmatprep.mubr.msk.f32.mxu1 %vm514_vm6, %v4087_v40 }
 0xdf8   :  { %3117 = vmatmul.mubr.msk.f32.gmra.mxu1 %vm514_vm6, %v4089_v41 }
 0xdf9   :  { %3119 = vmatprep.mubr.msk.f32.mxu1 %vm514_vm6, %v4079_v38 }
 0xdfc   :  { %3120 = vmatmul.mubr.msk.f32.gmra.mxu1 %vm514_vm6, %v4081_v23 }
 0xdfd   :  { %3122 = vmatprep.mubr.msk.f32.mxu1 %vm514_vm6, %v4075_v22 }
 0xe00   :  { %3123 = vmatmul.mubr.msk.f32.gmra.mxu1 %vm514_vm6, %v4071_v21 }
 0xeb4   :  { %v3115_v31 = vpop.f32.mrf.mxu1 }
 0xeb5   :  { %v1555_v30 = vmul.f32 0.35355338, %v3115_v31 }
 0xeb6   :  { %v1515_v26 = vpop.f32.mrf.mxu1 }
 0xeb7   :  { %v1554_v36 = vmul.f32 0.35355338, %v1515_v26  ;;  %v1563_v37 = vadd.f32 %v1555_v30, %v3806_v16 }
 0xeb8   :  { %v3118_v39 = vpop.f32.mrf.mxu1 }
 0xeb9   :  { %v1557_v47 = vmul.f32 0.35355338, %v3118_v39  ;;  %v1573_v49 = vsel %vm668_vm15, %v1563_v37, -inf  ;;  %v1562_v50 = vadd.f32 %v1554_v36, %v3829_v28 }
 0xeba   :  { %1574 = vmax.xlane.f32.xlu0 %v1573_v49  ;;  %v1525_v51 = vpop.f32.mrf.mxu1 }
 0xebb   :  { %v1556_v52 = vmul.f32 0.35355338, %v1525_v51  ;;  %v1570_v53 = vsel %vm668_vm15, %v1562_v50, -inf  ;;  %v1565_v54 = vadd.f32 %v1557_v47, %v3842_v48 }
 0xebc   :  { %1571 = vmax.xlane.f32.xlu1 %v1570_v53  ;;  %v3121_v56 = vpop.f32.mrf.mxu1 }
 0xebd   :  { %v1559_v58 = vmul.f32 0.35355338, %v3121_v56  ;;  %v1564_v59 = vadd.f32 %v1556_v52, %v3854_v55  ;;  %v1579_v1 = vsel %vm668_vm15, %v1565_v54, -inf }
 0xebe   :  { %v1535_v63 = vpop.f32.mrf.mxu1 }
 0xebf   :  { %v1558_v16 = vmul.f32 0.35355338, %v1535_v63  ;;  %v1576_v4 = vsel %vm668_vm15, %v1564_v59, -inf  ;;  %v1567_v28 = vadd.f32 %v1559_v58, %v3865_v60 }
 0xec0   :  { %1580 = vmax.xlane.f32.xlu1 %v1579_v1  ;;  %1577 = vmax.xlane.f32.xlu0 %v1576_v4  ;;  %v3124_v2 = vpop.f32.mrf.mxu1 }
 0xec1   :  { %v1561_v7 = vmul.f32 0.35355338, %v3124_v2  ;;  %v1566_v8 = vadd.f32 %v1558_v16, %v3878_v5  ;;  %v1585_v0 = vsel %vm668_vm15, %v1567_v28, -inf }
 0xec2   :  { %v1545_v48 = vpop.f32.mrf.mxu1 }
 0xec3   :  { %v1560_v10 = vmul.f32 0.35355338, %v1545_v48  ;;  %v1582_v55 = vsel %vm668_vm15, %v1566_v8, -inf  ;;  %v1569_v15 = vadd.f32 %v1561_v7, %v3885_v9 }
 0xec4   :  { %1586 = vmax.xlane.f32.xlu1 %v1585_v0  ;;  %1583 = vmax.xlane.f32.xlu0 %v1582_v55 }
 0xec5   :  { %v1568_v19 = vadd.f32 %v1560_v10, %v3890_v13  ;;  %v1591_v60 = vsel %vm668_vm15, %v1569_v15, -inf }
 0xec7   :  { %v1588_v35 = vsel %vm668_vm15, %v1568_v19, -inf }
 0xec8   :  { %1592 = vmax.xlane.f32.xlu1 %v1591_v60  ;;  %1589 = vmax.xlane.f32.xlu0 %v1588_v35 }
 0xed9   :  { %1670 = vrot.lane.b32.xlu1 %v4075_v22, %s3528_s2 }
 0xedd   :  { %1668 = vrot.lane.b32.xlu1 %v4081_v23, %s3528_s2 }
 0xede   :  { %1672 = vrot.lane.b32.xlu0 %v4071_v21, %s3528_s2 }
 0xee1   :  { %1664 = vrot.lane.b32.xlu1 %v4089_v41, %s3528_s2 }
 0xee2   :  { %1666 = vrot.lane.b32.xlu0 %v4079_v38, %s3528_s2 }
 0xee6   :  { %1662 = vrot.lane.b32.xlu0 %v4087_v40, %s3528_s2 }
 0xf43   :  { %v1575_v5 = vpop.xlane.xlu0 %1574 }
 0xf44   :  { %v1595_v9 = vsub.f32 %v1563_v37, %v1575_v5 }
 0xf45   :  { %v1572_v13 = vpop.xlane.xlu1 %1571 }
 0xf46   :  { %v1604_v24 = vmul.f32 1.442695, %v1595_v9  ;;  %v1594_v22 = vsub.f32 %v1562_v50, %v1572_v13 }
 0xf48   :  { %3306 = vpow2.f32 %v1604_v24  ;;  %v1602_v44 = vmul.f32 1.442695, %v1594_v22 }
 0xf49   :  { %v1581_v23 = vpop.xlane.xlu1 %1580  ;;  %v1578_v25 = vpop.xlane.xlu0 %1577 }
 0xf4a   :  { %3308 = vpow2.f32 %v1602_v44  ;;  %v1597_v21 = vsub.f32 %v1565_v54, %v1581_v23  ;;  %v1596_v27 = vsub.f32 %v1564_v59, %v1578_v25 }
 0xf4c   :  { %v1608_v45 = vmul.f32 1.442695, %v1597_v21  ;;  %v1606_v41 = vmul.f32 1.442695, %v1596_v27 }
 0xf4d   :  { %v1587_v29 = vpop.xlane.xlu1 %1586  ;;  %v1584_v32 = vpop.xlane.xlu0 %1583 }
 0xf4e   :  { %3310 = vpow2.f32 %v1608_v45  ;;  %v1599_v38 = vsub.f32 %v1567_v28, %v1587_v29  ;;  %v1598_v46 = vsub.f32 %v1566_v8, %v1584_v32 }
 0xf4f   :  { %3312 = vpow2.f32 %v1606_v41 }
 0xf50   :  { %v1612_v40 = vmul.f32 1.442695, %v1599_v38  ;;  %v1610_v31 = vmul.f32 1.442695, %v1598_v46 }
 0xf51   :  { %v1593_v30 = vpop.xlane.xlu1 %1592  ;;  %v1590_v26 = vpop.xlane.xlu0 %1589 }
 0xf52   :  { %3314 = vpow2.f32 %v1612_v40  ;;  %v1601_v36 = vsub.f32 %v1569_v15, %v1593_v30  ;;  %v1600_v37 = vsub.f32 %v1568_v19, %v1590_v26 }
 0xf53   :  { %3316 = vpow2.f32 %v1610_v31 }
 0xf54   :  { %v1616_v39 = vmul.f32 1.442695, %v1601_v36  ;;  %v1614_v47 = vmul.f32 1.442695, %v1600_v37  ;;  %v2764_v37 = vld [vmem:[%s4380_s8 + $0x38] sm:$0xff] }
 0xf55   :  { %v4157_v49 = vpop.eup %3306  ;;  %v1671_v50 = vpop.permute.xlu1 %1670 }
 0xf56   :  { %v1673_v51 = vpop.permute.xlu0 %1672  ;;  %3318 = vpow2.f32 %v1616_v39  ;;  %v1621_v52 = vsel %vm668_vm15, %v4157_v49, 0.0  ;;  %v2763_v39 = vld [vmem:[%s4380_s8 + $0x30] sm:$0xff] }
 0xf57   :  { %3125 = vmatprep.subr.mxu0 %v1673_v51  ;;  %v3309_v53 = vpop.eup %3308  ;;  %3320 = vpow2.f32 %v1614_v47  ;;  %1622 = vadd.xlane.f32.xlu1 %v1621_v52  ;;  %v2762_v47 = vld [vmem:[%s4380_s8 + $0x28] sm:$0xff] }
 0xf58   :  { %3126 = vmatpush3.msra.mxu0 %v1673_v51  ;;  %v1618_v54 = vsel %vm668_vm15, %v3309_v53, 0.0 }
 0xf59   :  { %3127 = vmatprep.subr.mxu0 %v1671_v50  ;;  %v1669_v56 = vpop.permute.xlu1 %1668  ;;  %1619 = vadd.xlane.f32.xlu0 %v1618_v54 }
 0xf5a   :  { %3128 = vmatpush3.msra.mxu0 %v1671_v50  ;;  %v1667_v58 = vpop.permute.xlu0 %1666 }
 0xf5b   :  { %3129 = vmatprep.subr.mxu0 %v1669_v56  ;;  %v3311_v59 = vpop.eup %3310 }
 0xf5c   :  { %3130 = vmatpush3.msra.mxu0 %v1669_v56  ;;  %v3313_v63 = vpop.eup %3312  ;;  %v1627_v16 = vsel %vm668_vm15, %v3311_v59, 0.0 }
 0xf5d   :  { %3131 = vmatprep.subr.mxu0 %v1667_v58  ;;  %1628 = vadd.xlane.f32.xlu1 %v1627_v16  ;;  %v1665_v1 = vpop.permute.xlu1 %1664  ;;  %v1624_v4 = vsel %vm668_vm15, %v3313_v63, 0.0 }
 0xf5e   :  { %3132 = vmatpush3.msra.mxu0 %v1667_v58  ;;  %1625 = vadd.xlane.f32.xlu0 %v1624_v4  ;;  %v1663_v2 = vpop.permute.xlu0 %1662 }
 0xf5f   :  { %3133 = vmatprep.subr.mxu0 %v1665_v1  ;;  %v3315_v28 = vpop.eup %3314 }
 0xf60   :  { %3134 = vmatpush3.msra.mxu0 %v1665_v1  ;;  %v3317_v7 = vpop.eup %3316  ;;  %v1633_v8 = vsel %vm668_vm15, %v3315_v28, 0.0 }
 0xf61   :  { %3135 = vmatprep.subr.mxu0 %v1663_v2  ;;  %1634 = vadd.xlane.f32.xlu1 %v1633_v8  ;;  %v1630_v48 = vsel %vm668_vm15, %v3317_v7, 0.0 }
 0xf62   :  { %3136 = vmatpush3.msra.mxu0 %v1663_v2  ;;  %1631 = vadd.xlane.f32.xlu0 %v1630_v48 }
 0xf63   :  { %v3319_v10 = vpop.eup %3318 }
 0xf64   :  { %v3321_v0 = vpop.eup %3320  ;;  %v1639_v55 = vsel %vm668_vm15, %v3319_v10, 0.0 }
 0xf65   :  { %1640 = vadd.xlane.f32.xlu1 %v1639_v55  ;;  %v1636_v15 = vsel %vm668_vm15, %v3321_v0, 0.0 }
 0xf66   :  { %1637 = vadd.xlane.f32.xlu0 %v1636_v15  ;;  %v1849_v15 = vrot.slane %v4049_v18, %v3959_v6 }
 0xf76   :  { %1660 = vrot.lane.b32.xlu1 %v4053_v20, %s3528_s2 }
 0xf7c   :  { %1658 = vrot.lane.b32.xlu0 %v4055_v43, %s3528_s2 }
 0xfe0   :  { %v1623_v19 = vpop.xlane.xlu1 %1622 }
 0xfe2   :  { %v1620_v60 = vpop.xlane.xlu0 %1619 }
 0xfe3   :  { %3322 = vrcp.f32 %v1620_v60 }
 0xfe4   :  { %3324 = vrcp.f32 %v1623_v19 }
 0xfe6   :  { %v1629_v35 = vpop.xlane.xlu1 %1628 }
 0xfe7   :  { %v1626_v5 = vpop.xlane.xlu0 %1625 }
 0xfe8   :  { %3326 = vrcp.f32 %v1626_v5 }
 0xfe9   :  { %3328 = vrcp.f32 %v1629_v35 }
 0xfea   :  { %v1635_v9 = vpop.xlane.xlu1 %1634 }
 0xfeb   :  { %v1632_v13 = vpop.xlane.xlu0 %1631 }
 0xfec   :  { %3330 = vrcp.f32 %v1632_v13 }
 0xfed   :  { %3332 = vrcp.f32 %v1635_v9 }
 0xfee   :  { %v1641_v24 = vpop.xlane.xlu1 %1640 }
 0xfef   :  { %v1638_v22 = vpop.xlane.xlu0 %1637 }
 0xff0   :  { %v3323_v44 = vpop.eup %3322  ;;  %3334 = vrcp.f32 %v1638_v22 }
 0xff1   :  { %3336 = vrcp.f32 %v1641_v24  ;;  %v1643_v20 = vmul.f32 %v3323_v44, %v3309_v53  ;;  %v3325_v23 = vpop.eup %3324 }
 0xff2   :  { %v1661_v43 = vpop.permute.xlu1 %1660  ;;  %v1645_v27 = vmul.f32 %v3325_v23, %v4157_v49  ;;  %v2761_v49 = vld [vmem:[%s4380_s8 + $0x20] sm:$0xff] }
 0xff3   :  { %3137 = vmatprep.subr.mxu0 %v1661_v43  ;;  %3141 = vmatprep.mubr.msk.f32.mxu0 %vm668_vm15, %v1643_v20  ;;  %v1659_v25 = vpop.permute.xlu0 %1658 }
 0xff4   :  { %3138 = vmatpush3.msra.mxu0 %v1661_v43 }
 0xff5   :  { %v3327_v21 = vpop.eup %3326  ;;  %3139 = vmatprep.subr.mxu0 %v1659_v25 }
 0xff6   :  { %v3329_v45 = vpop.eup %3328  ;;  %3140 = vmatpush3.msra.mxu0 %v1659_v25  ;;  %v1647_v41 = vmul.f32 %v3327_v21, %v3313_v63 }
 0xff7   :  { %3142 = vmatmul.mubr.msk.f32.vlgmr.msra.gmra.mxu0 %vm668_vm15, %v1645_v27  ;;  %v1649_v32 = vmul.f32 %v3329_v45, %v3311_v59  ;;  %3153 = vmatprep.subr.mxu0 %v2764_v37 }
 0xff8   :  { %3144 = vmatprep.mubr.msk.f32.mxu0 %vm668_vm15, %v1647_v41  ;;  %3154 = vmatpush3.msra.mxu0 %v2764_v37 }
 0xff9   :  { %v3331_v29 = vpop.eup %3330  ;;  %3155 = vmatprep.subr.mxu0 %v2763_v39 }
 0xffa   :  { %v3333_v38 = vpop.eup %3332  ;;  %v1651_v46 = vmul.f32 %v3331_v29, %v3317_v7  ;;  %3156 = vmatpush3.msra.mxu0 %v2763_v39  ;;  %v1974_v29 = vld [vmem:[#allocation8 + $0x30] sm:$0xff] }
 0xffb   :  { %3145 = vmatmul.mubr.msk.f32.gmra.mxu0 %vm668_vm15, %v1649_v32  ;;  %v1653_v31 = vmul.f32 %v3333_v38, %v3315_v28  ;;  %3157 = vmatprep.subr.mxu0 %v2762_v47  ;;  %v1973_v32 = vld [vmem:[#allocation8 + $0x28] sm:$0xff]  ;;  %v1972_v38 = vld [vmem:[#allocation8 + $0x20] sm:$0xff] }
 0xffc   :  { %3147 = vmatprep.mubr.msk.f32.mxu0 %vm668_vm15, %v1651_v46  ;;  %3158 = vmatpush3.msra.mxu0 %v2762_v47  ;;  %v2776_v46 = vld [vmem:[%s4382_s10 + $0x78] sm:$0xff] }
 0xffd   :  { %v3335_v40 = vpop.eup %3334  ;;  %3159 = vmatprep.subr.mxu0 %v2761_v49  ;;  %3175 = vmatprep.subr.mxu1 %v2776_v46 }
 0xffe   :  { %v3337_v30 = vpop.eup %3336  ;;  %v1655_v26 = vmul.f32 %v3335_v40, %v3321_v0  ;;  %3160 = vmatpush3.msra.mxu0 %v2761_v49  ;;  %v2775_v40 = vld [vmem:[%s4382_s10 + $0x70] sm:$0xff]  ;;  %3176 = vmatpush3.msra.mxu1 %v2776_v46 }
 0xfff   :  { %3148 = vmatmul.mubr.msk.f32.gmra.mxu0 %vm668_vm15, %v1653_v31  ;;  %v1657_v36 = vmul.f32 %v3337_v30, %v3319_v10  ;;  %v2774_v31 = vld [vmem:[%s4382_s10 + $0x68] sm:$0xff]  ;;  %3177 = vmatprep.subr.mxu1 %v2775_v40  ;;  %v2773_v30 = vld [vmem:[%s4382_s10 + $0x60] sm:$0xff] }
0x1000   :  { %3150 = vmatprep.mubr.msk.f32.mxu0 %vm668_vm15, %v1655_v26  ;;  %3178 = vmatpush3.msra.mxu1 %v2775_v40  ;;  %v2772_v26 = vld [vmem:[%s4382_s10 + $0x58] sm:$0xff] }
0x1001   :  { %3179 = vmatprep.subr.mxu1 %v2774_v31 }
0x1002   :  { %3180 = vmatpush3.msra.mxu1 %v2774_v31  ;;  %v2206_v31 = vld [vmem:[%s4384_s12 + $0x18] sm:$0xff] }
0x1003   :  { %3151 = vmatmul.mubr.msk.f32.gmra.mxu0 %vm668_vm15, %v1657_v36  ;;  %3181 = vmatprep.subr.mxu1 %v2773_v30 }
0x1004   :  { %3182 = vmatpush3.msra.mxu1 %v2773_v30  ;;  %v2205_v30 = vld [vmem:[%s4384_s12 + $0x10] sm:$0xff] }
0x1005   :  { %3183 = vmatprep.subr.mxu1 %v2772_v26 }
0x1006   :  { %3184 = vmatpush3.msra.mxu1 %v2772_v26  ;;  %v2204_v26 = vld [vmem:[%s4384_s12 + $0x8] sm:$0xff] }
0x10b7   :  { %v3143_v50 = vpop.f32.mrf.mxu0 }
0x10b9   :  { %v1772_v51 = vpop.f32.mrf.mxu0 }
0x10bb   :  { %v3146_v52 = vpop.f32.mrf.mxu0 }
0x10bc   :  { %1815 = vrot.lane.b32.xlu0 %v3146_v52, %s3512_s22  ;;  %v1962_v52 = vrot.slane %v4049_v18, %v3985_v57 }
0x10bd   :  { %v1782_v53 = vpop.f32.mrf.mxu0 }
0x10be   :  { %1813 = vrot.lane.b32.xlu1 %v1782_v53, %s3512_s22 }
0x10bf   :  { %v3149_v54 = vpop.f32.mrf.mxu0 }
0x10c0   :  { %1823 = vrot.lane.b32.xlu0 %v3149_v54, %s3524_s26 }
0x10c1   :  { %v1792_v56 = vpop.f32.mrf.mxu0 }
0x10c2   :  { %1821 = vrot.lane.b32.xlu1 %v1792_v56, %s3524_s26 }
0x10c3   :  { %v3152_v58 = vpop.f32.mrf.mxu0 }
0x10c4   :  { %1831 = vrot.lane.b32.xlu0 %v3152_v58, %s3529_s17 }
0x10c5   :  { %v1802_v59 = vpop.f32.mrf.mxu0 }
0x10c6   :  { %1829 = vrot.lane.b32.xlu1 %v1802_v59, %s3529_s17  ;;  %v1968_v59 = vrot.slane %v4049_v18, %v3990_v61 }
0x112e   :  { %v1816_v63 = vpop.permute.xlu0 %1815 }
0x112f   :  { %v1836_v7 = vsel %vm514_vm6, %v3143_v50, %v1816_v63 }
0x1130   :  { %v1814_v16 = vpop.permute.xlu1 %1813 }
0x1131   :  { %v1835_v28 = vsel %vm514_vm6, %v1772_v51, %v1814_v16 }
0x1132   :  { %v1824_v1 = vpop.permute.xlu0 %1823 }
0x1133   :  { %v1838_v10 = vsel %vm245_vm4, %v1836_v7, %v1824_v1  ;;  %v1979_v7 = vrot.slane %v4049_v18, %v4006_v12 }
0x1134   :  { %v1822_v4 = vpop.permute.xlu1 %1821 }
0x1135   :  { %v1837_v8 = vsel %vm245_vm4, %v1835_v28, %v1822_v4  ;;  %v2771_v4 = vld [vmem:[%s4382_s10 + $0x50] sm:$0xff]  ;;  %v2770_v28 = vld [vmem:[%s4382_s10 + $0x48] sm:$0xff] }
0x1136   :  { %v1832_v2 = vpop.permute.xlu0 %1831  ;;  %3185 = vmatprep.subr.mxu1 %v2771_v4 }
0x1137   :  { %v1840_v55 = vsel %vm938_vm9, %v1838_v10, %v1832_v2  ;;  %3186 = vmatpush3.msra.mxu1 %v2771_v4  ;;  %v2769_v2 = vld [vmem:[%s4382_s10 + $0x40] sm:$0xff] }
0x1138   :  { %v1830_v48 = vpop.permute.xlu1 %1829  ;;  %3187 = vmatprep.subr.mxu1 %v2770_v28 }
0x1139   :  { %v1839_v0 = vsel %vm938_vm9, %v1837_v8, %v1830_v48  ;;  %3188 = vmatpush3.msra.mxu1 %v2770_v28 }
0x113a   :  { %3161 = vmatprep.mubr.msk.f32.mxu0 %vm341_vm5, %v1839_v0  ;;  %3189 = vmatprep.subr.mxu1 %v2769_v2 }
0x113b   :  { %3162 = vmatmul.mubr.msk.f32.vlgmr.msra.gmra.mxu0 %vm341_vm5, %v1840_v55  ;;  %3190 = vmatpush3.msra.mxu1 %v2769_v2 }
0x113c   :  { %3205 = vmatprep.subr.mxu1 %v3519_v14 }
0x11fb   :  { %v3163_v19 = vpop.f32.mrf.mxu0 }
0x11fc   :  { %v1928_v60 = vadd.f32 %v3163_v19, %v1849_v15  ;;  %v2075_v19 = vrot.slane %v4049_v18, %v4013_v42 }
0x11fd   :  { %v1922_v35 = vpop.f32.mrf.mxu0 }
0x11fe   :  { %v1932_v5 = vadd.f32 %v1928_v60, %v4043_v17  ;;  %v1923_v9 = vadd.f32 %v1922_v35, %v1849_v15 }
0x1200   :  { %v1931_v13 = vadd.f32 %v1923_v9, %v4041_v11  ;;  %v1936_v24 = vsel %vm341_vm5, %v1932_v5, 0.0  ;;  %v1975_v11 = vld [vmem:[#allocation8 + $0x38] sm:$0xff] }
0x1201   :  { %1937 = vadd.xlane.f32.xlu0 %v1936_v24  ;;  %3164 = vmatprep.subr.mxu0 %v1975_v11 }
0x1202   :  { %v1933_v22 = vsel %vm341_vm5, %v1931_v13, 0.0  ;;  %3165 = vmatpush3.msra.mxu0 %v1975_v11 }
0x1203   :  { %1934 = vadd.xlane.f32.xlu1 %v1933_v22  ;;  %3166 = vmatprep.subr.mxu0 %v1974_v29 }
0x1204   :  { %3167 = vmatpush3.msra.mxu0 %v1974_v29  ;;  %v2370_v29 = vld [vmem:[%s4373_s1] sm:$0xff] }
0x1205   :  { %3168 = vmatprep.subr.mxu0 %v1973_v32  ;;  %vm2372_vm4 = vcmp.eq.s32.totalorder %v2370_v29, 0 }
0x1206   :  { %3169 = vmatpush3.msra.mxu0 %v1973_v32  ;;  %v2371_v32 = vld [vmem:[%s4373_s1 + $0x8] sm:$0xff] }
0x1207   :  { %3170 = vmatprep.subr.mxu0 %v1972_v38  ;;  %vm2373_vm6 = vcmp.eq.s32.totalorder %v2371_v32, 0 }
0x1208   :  { %3171 = vmatpush3.msra.mxu0 %v1972_v38  ;;  %v2785_v38 = vsel %vm2372_vm4, 1.0, %v3519_v14  ;;  %v2786_v46 = vsel %vm2373_vm6, 1.0, %v3519_v14 }
0x1209   :  { %3194 = vmatprep.subr.mxu0 %v3519_v14  ;;  %v3261_v40 = vpack.i.bf16 %v2786_v46, %v2785_v38 }
0x128a   :  { %v1938_v44 = vpop.xlane.xlu0 %1937 }
0x128b   :  { %v1940_v20 = vmul.f32 0.03125, %v1938_v44 }
0x128c   :  { %v1935_v23 = vpop.xlane.xlu1 %1934 }
0x128d   :  { %v1942_v43 = vsub.f32 %v1932_v5, %v1940_v20  ;;  %v1939_v25 = vmul.f32 0.03125, %v1935_v23 }
0x128f   :  { %v1941_v21 = vsub.f32 %v1931_v13, %v1939_v25  ;;  %v1944_v27 = vmul.f32 %v1942_v43, %v1942_v43 }
0x1291   :  { %v1948_v45 = vsel %vm341_vm5, %v1944_v27, 0.0  ;;  %v1943_v41 = vmul.f32 %v1941_v21, %v1941_v21 }
0x1292   :  { %1949 = vadd.xlane.f32.xlu1 %v1948_v45 }
0x1293   :  { %v1945_v17 = vsel %vm341_vm5, %v1943_v41, 0.0 }
0x1294   :  { %1946 = vadd.xlane.f32.xlu0 %v1945_v17 }
0x131b   :  { %v1950_v36 = vpop.xlane.xlu1 %1949 }
0x131c   :  { %v1952_v37 = vmul.f32 0.03125, %v1950_v36  ;;  %v2203_v36 = vld [vmem:[%s4384_s12] sm:$0xff] }
0x131d   :  { %v1947_v39 = vpop.xlane.xlu0 %1946 }
0x131e   :  { %v1954_v47 = vadd.f32 1e-05, %v1952_v37  ;;  %v1951_v49 = vmul.f32 0.03125, %v1947_v39  ;;  %v2790_v37 = vld [vmem:[%s4384_s12 + $0x58] sm:$0xff] }
0x1320   :  { %3338 = vrsqrt.f32 %v1954_v47  ;;  %v1953_v50 = vadd.f32 1e-05, %v1951_v49 }
0x1322   :  { %3340 = vrsqrt.f32 %v1953_v50 }
0x132d   :  { %v3339_v51 = vpop.eup %3338 }
0x132e   :  { %v1958_v53 = vmul.f32 %v3339_v51, %v1942_v43 }
0x132f   :  { %v3341_v54 = vpop.eup %3340 }
0x1330   :  { %v1957_v56 = vmul.f32 %v3341_v54, %v1941_v21  ;;  %v1964_v58 = vmul.f32 %v1962_v52, %v1958_v53  ;;  %v2188_v53 = vrot.slane %v4049_v18, %v1285_v62 }
0x1332   :  { %v1963_v63 = vmul.f32 %v1962_v52, %v1957_v56  ;;  %v1970_v1 = vadd.f32 %v1968_v59, %v1964_v58  ;;  %v2194_v58 = vrot.slane %v4049_v18, %v1291_v3  ;;  %v2788_v3 = vld [vmem:[%s4384_s12 + $0x48] sm:$0xff]  ;;  %v2787_v18 = vld [vmem:[%s4384_s12 + $0x40] sm:$0xff] }
0x1334   :  { %v1969_v16 = vadd.f32 %v1968_v59, %v1963_v63 }
0x1336   :  { %3172 = vmatprep.mubr.msk.f32.mxu0 %vm341_vm5, %v1969_v16 }
0x1337   :  { %3173 = vmatmul.mubr.msk.f32.vlgmr.msra.gmra.mxu0 %vm341_vm5, %v1970_v1 }
0x1338   :  { %3195 = vmatpush3.msra.mxu0 %v2206_v31 }
0x1339   :  { %3196 = vmatprep.subr.mxu0 %v3519_v14 }
0x133a   :  { %3197 = vmatpush3.msra.mxu0 %v2205_v30 }
0x133b   :  { %3198 = vmatprep.subr.mxu0 %v3519_v14 }
0x133c   :  { %3199 = vmatpush3.msra.mxu0 %v2204_v26 }
0x133d   :  { %3200 = vmatprep.subr.mxu0 %v3519_v14 }
0x133e   :  { %3201 = vmatpush3.msra.mxu0 %v2203_v36 }
0x133f   :  { %3216 = vmatprep.subr.mxu0 %v2790_v37 }
0x13f7   :  { %v3174_v8 = vpop.f32.mrf.mxu0 }
0x13f8   :  { %v2058_v48 = vadd.f32 %v3174_v8, %v1979_v7 }
0x13f9   :  { %v2052_v10 = vpop.f32.mrf.mxu0 }
0x13fa   :  { %v2053_v0 = vadd.f32 %v2052_v10, %v1979_v7  ;;  %v2062_v15 = vmax.f32 %v2058_v48, 0.0 }
0x13fc   :  { %v2061_v55 = vmax.f32 %v2053_v0, 0.0 }
0x13fe   :  { %3191 = vmatprep.mubr.msk.f32.mxu1 %vm668_vm15, %v2061_v55  ;;  %v2783_v55 = vld [vmem:[%s4384_s12 + $0x38] sm:$0xff] }
0x13ff   :  { %3192 = vmatmul.mubr.msk.f32.vlgmr.msra.gmra.mxu1 %vm668_vm15, %v2062_v15  ;;  %vm3530_vm15 = vmmov 0   ;;  %v2782_v15 = vld [vmem:[%s4384_s12 + $0x30] sm:$0xff] }
0x1400   :  { %3202 = vmatprep.mubr.msk.f32.mxu0 %vm3530_vm15, %v3519_v14  ;;  %3213 = vmatprep.mubr.msk.f32.mxu1 %vm3530_vm15, %v3519_v14 }
0x1401   :  { %3206 = vmatpush3.msra.mxu1 %v2783_v55 }
0x1402   :  { %3207 = vmatprep.subr.mxu1 %v3519_v14 }
0x1403   :  { %3208 = vmatpush3.msra.mxu1 %v2782_v15 }
0x1404   :  { %3209 = vmatprep.subr.mxu1 %v3519_v14 }
0x14bf   :  { %v3193_v60 = vpop.f32.mrf.mxu1 }
0x14c0   :  { %v2154_v35 = vadd.f32 %v3193_v60, %v2075_v19  ;;  %v2780_v60 = vld [vmem:[%s4384_s12 + $0x20] sm:$0xff] }
0x14c1   :  { %v2148_v5 = vpop.f32.mrf.mxu1 }
0x14c2   :  { %v2158_v9 = vadd.f32 %v2154_v35, %v1970_v1  ;;  %v2149_v13 = vadd.f32 %v2148_v5, %v2075_v19  ;;  %v2781_v19 = vld [vmem:[%s4384_s12 + $0x28] sm:$0xff] }
0x14c3   :  { %3210 = vmatpush3.msra.mxu1 %v2781_v19  ;;  %v4326_v35 = vld [vmem:[#allocation11] sm:$0xff] }
0x14c4   :  { %v2157_v24 = vadd.f32 %v2149_v13, %v1969_v16  ;;  %v2162_v22 = vsel %vm341_vm5, %v2158_v9, 0.0  ;;  %3211 = vmatprep.subr.mxu1 %v3519_v14  ;;  %v2210_v5 = vrot.slane %v4326_v35, %v3698_v34 }
0x14c5   :  { %2163 = vadd.xlane.f32.xlu0 %v2162_v22  ;;  %3212 = vmatpush3.msra.mxu1 %v2780_v60  ;;  %v2398_v22 = vrot.slane %v4326_v35, %v4006_v12 }
0x14c6   :  { %v2159_v44 = vsel %vm341_vm5, %v2157_v24, 0.0 }
0x14c7   :  { %2160 = vadd.xlane.f32.xlu1 %v2159_v44 }
0x154e   :  { %v2164_v20 = vpop.xlane.xlu0 %2163 }
0x154f   :  { %v2166_v23 = vmul.f32 0.03125, %v2164_v20 }
0x1550   :  { %v2161_v43 = vpop.xlane.xlu1 %2160 }
0x1551   :  { %v2168_v25 = vsub.f32 %v2158_v9, %v2166_v23  ;;  %v2165_v21 = vmul.f32 0.03125, %v2161_v43 }
0x1553   :  { %v2167_v27 = vsub.f32 %v2157_v24, %v2165_v21  ;;  %v2170_v45 = vmul.f32 %v2168_v25, %v2168_v25 }
0x1555   :  { %v2174_v41 = vsel %vm341_vm5, %v2170_v45, 0.0  ;;  %v2169_v17 = vmul.f32 %v2167_v27, %v2167_v27 }
0x1556   :  { %2175 = vadd.xlane.f32.xlu0 %v2174_v41 }
0x1557   :  { %v2171_v11 = vsel %vm341_vm5, %v2169_v17, 0.0 }
0x1558   :  { %2172 = vadd.xlane.f32.xlu1 %v2171_v11 }
0x156c   :  { %3262 = vperm.xlu0 %3260, %v3261_v40  }
0x15df   :  { %v2176_v39 = vpop.xlane.xlu0 %2175 }
0x15e0   :  { %v2178_v47 = vmul.f32 0.03125, %v2176_v39 }
0x15e1   :  { %v2173_v49 = vpop.xlane.xlu1 %2172 }
0x15e2   :  { %v2180_v50 = vadd.f32 1e-05, %v2178_v47  ;;  %v2177_v51 = vmul.f32 0.03125, %v2173_v49 }
0x15e4   :  { %3342 = vrsqrt.f32 %v2180_v50  ;;  %v2179_v52 = vadd.f32 1e-05, %v2177_v51 }
0x15e6   :  { %3344 = vrsqrt.f32 %v2179_v52 }
0x15e7   :  { %v4291_v1 = vpop.permute.xlu0 %3262 }
0x15e8   :  { %v3264_v7 = vunpack.i.l.bf16 %v4291_v1  ;;  %v3265_v10 = vunpack.i.h.bf16 %v4291_v1 }
0x15f1   :  { %v3343_v54 = vpop.eup %3342 }
0x15f2   :  { %v2184_v56 = vmul.f32 %v3343_v54, %v2168_v25 }
0x15f3   :  { %v3345_v59 = vpop.eup %3344 }
0x15f4   :  { %v2190_v63 = vmul.f32 %v2188_v53, %v2184_v56  ;;  %v2183_v16 = vmul.f32 %v3345_v59, %v2167_v27 }
0x15f6   :  { %v2196_v4 = vadd.f32 %v2194_v58, %v2190_v63  ;;  %v2189_v28 = vmul.f32 %v2188_v53, %v2183_v16 }
0x15f8   :  { %v2199_v2 = vrot.slane %v2196_v4, 7  ;;  %v2195_v8 = vadd.f32 %v2194_v58, %v2189_v28  ;;  %v2389_v0 = vmul.f32 %v3265_v10, %v2196_v4 }
0x15fa   :  { %v2388_v62 = vmul.f32 %v3264_v7, %v2195_v8  ;;  %v2202_v48 = vsel %vm2201_vm0, %v2195_v8, %v2199_v2 }
0x15fb   :  { %3203 = vmatmul.mubr.msk.f32.vlgmr.msra.gmra.mxu0 %vm341_vm5, %v2202_v48 }
0x15fc   :  { %3217 = vmatpush3.msra.mxu0 %v2790_v37  ;;  %3224 = vmatprep.mubr.msk.f32.mxu0 %vm341_vm5, %v2388_v62 }
0x15fd   :  { %3218 = vmatprep.subr.mxu0 %v2789_v33 }
0x15fe   :  { %3219 = vmatpush3.msra.mxu0 %v2789_v33 }
0x15ff   :  { %3220 = vmatprep.subr.mxu0 %v2788_v3 }
0x1600   :  { %3221 = vmatpush3.msra.mxu0 %v2788_v3 }
0x1601   :  { %3222 = vmatprep.subr.mxu0 %v2787_v18 }
0x1602   :  { %3223 = vmatpush3.msra.mxu0 %v2787_v18 }
0x1603   :  { %3225 = vmatmul.mubr.msk.f32.vlgmr.msra.gmra.mxu0 %vm341_vm5, %v2389_v0 }
0x16bb   :  { %v2280_v9 = vpop.f32.mrf.mxu0 }
0x16bc   :  { %v2281_v13 = vadd.f32 %v2280_v9, %v2210_v5 }
0x16bd   :  { %v3204_v24 = vpop.f32.mrf.mxu0 }
0x16be   :  { %3346 = vtanh.f32 %v2281_v13 }
0x16c3   :  { %v3226_v44 = vpop.f32.mrf.mxu0 }
0x16c4   :  { %v2477_v20 = vadd.f32 %v3226_v44, %v2398_v22 }
0x16c5   :  { %v2471_v14 = vpop.f32.mrf.mxu0 }
0x16c6   :  { %v2483_v23 = vmul.f32 0.70710677, %v2477_v20  ;;  %v2472_v43 = vadd.f32 %v2471_v14, %v2398_v22  ;;  %v2481_v9 = vmul.f32 0.5, %v2477_v20 }
0x16c8   :  { %v2485_v25 = vand.u32 2147483647, %v2483_v23  ;;  %v2482_v21 = vmul.f32 0.70710677, %v2472_v43  ;;  %vm2525_vm1 = vcmp.lt.f32.partialorder %v2483_v23, 0.0  ;;  %v2480_v19 = vmul.f32 0.5, %v2472_v43 }
0x16c9   :  { %v2366_v23 = vrot.slane %v4326_v35, %v3959_v6  ;;  %v2796_v6 = vld [vmem:[%s4384_s12 + $0x78] sm:$0xff] }
0x16ca   :  { %v2487_v27 = vmul.f32 0.3275911, %v2485_v25  ;;  %v2484_v45 = vand.u32 2147483647, %v2482_v21  ;;  %v2513_v29 = vsub.f32 0.0, %v2485_v25  ;;  %vm2524_vm2 = vcmp.lt.f32.partialorder %v2482_v21, 0.0  ;;  %3227 = vmatprep.subr.mxu1 %v2796_v6 }
0x16cb   :  { %v3347_v41 = vpop.eup %3346 }
0x16cc   :  { %v2489_v17 = vadd.f32 1.0, %v2487_v27  ;;  %v2486_v11 = vmul.f32 0.3275911, %v2484_v45  ;;  %3214 = vmatmul.mubr.msk.f32.vlgmr.msra.gmra.mxu1 %vm341_vm5, %v3347_v41  ;;  %v2512_v32 = vsub.f32 0.0, %v2484_v45  ;;  %v2515_v12 = vmul.f32 %v2513_v29, %v2485_v25 }
0x16cd   :  { %3228 = vmatpush3.msra.mxu1 %v2796_v6 }
0x16ce   :  { %3348 = vrcp.f32 %v2489_v17  ;;  %v2488_v34 = vadd.f32 1.0, %v2486_v11  ;;  %v2514_v46 = vmul.f32 %v2512_v32, %v2484_v45  ;;  %v2518_v40 = vmul.f32 1.442695, %v2515_v12  ;;  %v2795_v12 = vld [vmem:[%s4384_s12 + $0x70] sm:$0xff] }
0x16cf   :  { %3229 = vmatprep.subr.mxu1 %v2795_v12 }
0x16d0   :  { %3350 = vrcp.f32 %v2488_v34  ;;  %v2516_v36 = vmul.f32 1.442695, %v2514_v46  ;;  %3230 = vmatpush3.msra.mxu1 %v2795_v12  ;;  %v2793_v46 = vld [vmem:[%s4384_s12 + $0x60] sm:$0xff] }
0x16d1   :  { %3352 = vpow2.f32 %v2518_v40 }
0x16d2   :  { %3354 = vpow2.f32 %v2516_v36 }
0x16db   :  { %v3349_v38 = vpop.eup %3348 }
0x16dc   :  { %v2495_v31 = vmul.f32 1.0614054, %v3349_v38 }
0x16dd   :  { %v3351_v30 = vpop.eup %3350 }
0x16de   :  { %v2497_v26 = vadd.f32 -1.4531521, %v2495_v31  ;;  %v2494_v37 = vmul.f32 1.0614054, %v3351_v30  ;;  %v3353_v4 = vpop.eup %3352 }
0x16df   :  { %v3355_v62 = vpop.eup %3354 }
0x16e0   :  { %v2499_v39 = vmul.f32 %v3349_v38, %v2497_v26  ;;  %v2496_v47 = vadd.f32 -1.4531521, %v2494_v37 }
0x16e2   :  { %v2501_v49 = vadd.f32 1.4214138, %v2499_v39  ;;  %v2498_v50 = vmul.f32 %v3351_v30, %v2496_v47  ;;  %v2563_v39 = vrot.slane %v4326_v35, %v4013_v42 }
0x16e4   :  { %v2503_v51 = vmul.f32 %v3349_v38, %v2501_v49  ;;  %v2500_v52 = vadd.f32 1.4214138, %v2498_v50  ;;  %v2569_v50 = vrot.slane %v4326_v35, %v3985_v57 }
0x16e6   :  { %v2505_v53 = vadd.f32 -0.28449672, %v2503_v51  ;;  %v2502_v54 = vmul.f32 %v3351_v30, %v2500_v52 }
0x16e8   :  { %v2507_v56 = vmul.f32 %v3349_v38, %v2505_v53  ;;  %v2504_v58 = vadd.f32 -0.28449672, %v2502_v54 }
0x16ea   :  { %v2509_v59 = vadd.f32 0.2548296, %v2507_v56  ;;  %v2506_v63 = vmul.f32 %v3351_v30, %v2504_v58 }
0x16ec   :  { %v2511_v16 = vmul.f32 %v3349_v38, %v2509_v59  ;;  %v2508_v28 = vadd.f32 0.2548296, %v2506_v63  ;;  %v2794_v38 = vld [vmem:[%s4384_s12 + $0x68] sm:$0xff]  ;;  %s3531_s12 = smov [#allocation13]  }
0x16ed   :  { %3231 = vmatprep.subr.mxu1 %v2794_v38  ;;  %s2677_s1 = sshll.u32 %s3531_s12, 4  ;;  %s2678_s1 = int_to_ptr.vmem [resolvable:$true] %s2677_s1 }
0x16ee   :  { %v2521_v2 = vmul.f32 %v3353_v4, %v2511_v16  ;;  %v2510_v8 = vmul.f32 %v3351_v30, %v2508_v28  ;;  %3232 = vmatpush3.msra.mxu1 %v2794_v38  ;;  %s3480_s2 = scalar_lea.vmem %s2678_s1, 32  ;;  %p3485_p3 = scmp.lt.s32.totalorder %s2678_s1, %s2678_s1 }
0x16ef   :  { %3233 = vmatprep.subr.mxu1 %v2793_v46  ;;  %p3481_p2 = scmp.ne.s32.totalorder %s2678_s1, %s3480_s2  ;;  %p3486_p4 = scmp.lt.s32.totalorder %s3480_s2, %s3480_s2 }
0x16f0   :  { %v2523_v48 = vsub.f32 1.0, %v2521_v2  ;;  %v2520_v33 = vmul.f32 %v3355_v62, %v2510_v8  ;;  %3234 = vmatpush3.msra.mxu1 %v2793_v46 }
0x16f1   :  { %p3487_p5 = por %p3486_p4, %p3485_p3 }
0x16f2   :  { %v2527_v3 = vsub.f32 0.0, %v2523_v48  ;;  %v2522_v18 = vsub.f32 1.0, %v2520_v33 }
0x16f3   :  { %p3488_p6 = pnand %p3487_p5, %p3481_p2 }
0x16f4   :  { %v2526_v0 = vsub.f32 0.0, %v2522_v18  ;;  %v2529_v55 = vsel %vm2525_vm1, %v2527_v3, %v2523_v48 }
0x16f5   :  { %v2531_v5 = vadd.f32 1.0, %v2529_v55 }
0x16f6   :  { %v2528_v15 = vsel %vm2524_vm2, %v2526_v0, %v2522_v18 }
0x16f7   :  { %v2530_v60 = vadd.f32 1.0, %v2528_v15  ;;  %v2533_v22 = vmul.f32 %v2531_v5, %v2481_v9 }
0x16f9   :  { %v2532_v13 = vmul.f32 %v2530_v60, %v2480_v19  ;;  %v2537_v44 = vsel %vm341_vm5, %v2533_v22, 0.0 }
0x16fb   :  { %v2534_v24 = vsel %vm341_vm5, %v2532_v13, 0.0 }
0x16fc   :  { %2535 = vadd.xlane.f32.xlu1 %v2534_v24 }
0x1700   :  { %2538 = vadd.xlane.f32.xlu1 %v2537_v44 }
0x1785   :  { %v2536_v14 = vpop.xlane.xlu1 %2535 }
0x1786   :  { %v2540_v25 = vmul.f32 0.03125, %v2536_v14 }
0x1788   :  { %v2542_v27 = vsub.f32 %v2532_v13, %v2540_v25 }
0x1789   :  { %v2539_v21 = vpop.xlane.xlu1 %2538 }
0x178a   :  { %v2541_v45 = vmul.f32 0.03125, %v2539_v21  ;;  %v2544_v43 = vmul.f32 %v2542_v27, %v2542_v27 }
0x178c   :  { %v2359_v41 = vpop.f32.mrf.mxu1  ;;  %v2543_v20 = vsub.f32 %v2533_v22, %v2541_v45  ;;  %v2546_v11 = vsel %vm341_vm5, %v2544_v43, 0.0 }
0x178d   :  { %v2367_v17 = vadd.f32 %v2366_v23, %v2359_v41  ;;  %2547 = vadd.xlane.f32.xlu1 %v2546_v11 }
0x178e   :  { %v3215_v34 = vpop.f32.mrf.mxu1  ;;  %v2545_v29 = vmul.f32 %v2543_v20, %v2543_v20 }
0x178f   :  { %2369 = vst.msk [vmem:[#allocation13] sm:$0x3] %vm2368_vm3, %v2367_v17 }
0x1790   :  { %v2549_v32 = vsel %vm341_vm5, %v2545_v29, 0.0 }
0x1791   :  { %2550 = vadd.xlane.f32.xlu1 %v2549_v32 }
0x1816   :  { %v2548_v40 = vpop.xlane.xlu1 %2547 }
0x1817   :  { %v2552_v31 = vmul.f32 0.03125, %v2548_v40 }
0x1819   :  { %v2554_v30 = vadd.f32 1e-05, %v2552_v31 }
0x181a   :  { %v2551_v26 = vpop.xlane.xlu1 %2550 }
0x181b   :  { %3356 = vrsqrt.f32 %v2554_v30  ;;  %v2553_v36 = vmul.f32 0.03125, %v2551_v26 }
0x181d   :  { %v2555_v37 = vadd.f32 1e-05, %v2553_v36 }
0x181f   :  { %3358 = vrsqrt.f32 %v2555_v37 }
0x1828   :  { %v3357_v47 = vpop.eup %3356 }
0x1829   :  { %v2558_v49 = vmul.f32 %v3357_v47, %v2542_v27 }
0x182b   :  { %v2564_v51 = vmul.f32 %v2563_v39, %v2558_v49 }
0x182c   :  { %v3359_v52 = vpop.eup %3358 }
0x182d   :  { %v2559_v53 = vmul.f32 %v3359_v52, %v2543_v20  ;;  %v2570_v54 = vadd.f32 %v2569_v50, %v2564_v51 }
0x182f   :  { %v2565_v56 = vmul.f32 %v2563_v39, %v2559_v53  ;;  %3235 = vmatprep.mubr.msk.f32.mxu1 %vm341_vm5, %v2570_v54 }
0x1831   :  { %v2571_v58 = vadd.f32 %v2569_v50, %v2565_v56 }
0x1833   :  { %3236 = vmatmul.mubr.msk.f32.vlgmr.msra.gmra.mxu1 %vm341_vm5, %v2571_v58 }
0x1834   :  { %3491 = shalt.err (!%p3488_p6)
}
0x1835   :  { %2680 = dma.vmem_to_hbm [thread:$0]  %s2678_s1, 32, %s4387_s15, [#allocation4]   ;;  %v2661_v57 = vrot.slane %v4326_v35, %v3990_v61  ;;  %vm2666_vm5 = vcmask 97280  }
0x18f3   :  { %v3237_v42 = vpop.f32.mrf.mxu1 }
0x18f4   :  { %v2663_v59 = vadd.f32 %v3237_v42, %v2661_v57 }
0x18f5   :  { %v2649_v63 = vpop.f32.mrf.mxu1 }
0x18f6   :  { %v2665_v16 = vmul.f32 %v3265_v10, %v2663_v59  ;;  %v2662_v4 = vadd.f32 %v2661_v57, %v2649_v63 }
0x18f8   :  { %2668 = vst.msk [vmem:[%s4386_s14 + $0x8] sm:$0xff] %vm2666_vm5, %v2665_v16  ;;  %v2664_v28 = vmul.f32 %v3264_v7, %v2662_v4 }
0x18fa   :  { %2667 = vst.msk [vmem:[%s4386_s14] sm:$0xff] %vm2666_vm5, %v2664_v28 }
0x18fb   :  { %3508 = dma.done.wait [#allocation4], 32  }
0x18fc   :  { %3509 = vsyncadd [#allocation4], 4294967264 }
0x18fd   :  { %2686 = vsyncpa [#allocation3], 1 }
0x18fe   :  { %2687 = vsyncpa [#allocation6], 1 }
0x18ff   :  { %2688 = vsyncpa [#allocation9], 1 }
0x1900   :  { %2689 = vsyncpa [#allocation12], 1 }
0x1901   :  { %2690 = vsyncpa [#allocation4], 1 }

</bundles_post_ra>
